<compile_context>
chip_gen: v7x
topology: tpu7x:2x2x1
jax: 0.10.0
libtpu: 0.0.40
codegen_flags: <defaults>
</compile_context>

<pallas_src>
import functools

import jax
import jax.numpy as jnp
from jax.experimental import pallas as pl
from jax.experimental.pallas import tpu as pltpu

EPS = 1e-5  # nn.InstanceNorm2d default eps


def convblock_kernel(x_ref, w_ref, o_ref, *, K, stride, Ho, Wo, use_act):
    """One grid step processes `bsz` images.

    x_ref: (bsz, Hp, Wp, Cin)   padded NHWC input tile (compute dtype)
    w_ref: (Cout, K*K*Cin)      conv weight, columns ordered (ky, kx, cin)
    o_ref: (bsz, Cout, P)       normalized + activated output, P = Ho*Wo
    """
    bsz = x_ref.shape[0]
    P = Ho * Wo
    w = w_ref[...]                                 # (Cout, K*K*Cin), loaded once

    for b in range(bsz):                           # static unroll, bsz is small
        x = x_ref[b]                               # (Hp, Wp, Cin)

        # im2col as a (P, K*K*Cin) value: nine shifted-window views, each a
        # layout-friendly leading-dims reshape, concatenated on the lane axis.
        # Never materialized in HBM.
        pieces = []
        for dy in range(K):
            for dx in range(K):
                win = x[dy:dy + (Ho - 1) * stride + 1:stride,
                        dx:dx + (Wo - 1) * stride + 1:stride, :]    # (Ho,Wo,Cin)
                pieces.append(win.reshape(P, win.shape[-1]))        # (P, Cin)
        col = jnp.concatenate(pieces, axis=1)                       # (P, K*K*Cin)

        # Single MXU contraction of depth K*K*Cin producing (Cout, P) directly
        # (dense f32 result, no output transpose, no per-tap accumulates).
        y = jax.lax.dot_general(
            w, col, (((1,), (1,)), ((), ())),
            preferred_element_type=jnp.float32)                     # (Cout, P)

        # InstanceNorm2d (affine=False, biased variance) over the spatial dim P
        # independently per channel.  f32 math; rsqrt goes to the EUP.
        mean = jnp.mean(y, axis=1, keepdims=True)                   # (Cout, 1)
        d = y - mean
        var = jnp.mean(d * d, axis=1, keepdims=True)
        yn = d * jax.lax.rsqrt(var + EPS)

        if use_act:
            yn = jnp.maximum(yn, 0.0)                               # ReLU
        o_ref[b] = yn.astype(o_ref.dtype)


def _pick_images_per_step(n):
    """Amortize per-grid-step overhead while keeping >=2 steps for v7x's 2 TCs."""
    if n <= 2:
        return 1
    for cand in range(min(8, n // 2), 0, -1):
        if n % cand == 0:
            return cand
    return 1


def conv_block(x_nchw, weight, bias=None, *, stride=1, padding=1, use_act=True,
               compute_dtype=jnp.bfloat16, out_dtype=None, images_per_step=None):
    """x_nchw: (N, Cin, H, W); weight: (Cout, Cin, K, K); bias: (Cout,) or None.

    The conv bias is accepted for API parity but never used: it is cancelled
    exactly by InstanceNorm2d's per-channel mean subtraction (affine=False),
    so dropping it is a numeric no-op and saves a DMA + broadcast add.
    """
    del bias
    N, Cin, H, W = x_nchw.shape
    Cout, _, K, _ = weight.shape
    Ho = (H + 2 * padding - K) // stride + 1
    Wo = (W + 2 * padding - K) // stride + 1
    P = Ho * Wo
    Hp, Wp = H + 2 * padding, W + 2 * padding
    out_dtype = compute_dtype if out_dtype is None else out_dtype
    B = _pick_images_per_step(N) if images_per_step is None else images_per_step
    assert N % B == 0, "images_per_step must divide the batch"

    # Data rearrangement only (no K*K expansion): NCHW -> padded NHWC + cast.
    x = jnp.transpose(x_nchw, (0, 2, 3, 1))                         # (N, H, W, Cin)
    xp = jnp.pad(x, ((0, 0), (padding, padding), (padding, padding), (0, 0)))
    xp = xp.astype(compute_dtype)

    # (Cout, Cin, K, K) -> (Cout, K, K, Cin) -> (Cout, K*K*Cin); column order
    # (ky, kx, cin) matches the kernel's im2col build.
    w = jnp.transpose(weight, (0, 2, 3, 1)).reshape(Cout, K * K * Cin)
    w = w.astype(compute_dtype)

    kernel = functools.partial(convblock_kernel, K=K, stride=stride,
                               Ho=Ho, Wo=Wo, use_act=use_act)

    itemsize = jnp.dtype(compute_dtype).itemsize
    bytes_accessed = ((N * Hp * Wp * Cin + K * K * Cin * Cout) * itemsize
                      + N * Cout * P * jnp.dtype(out_dtype).itemsize)
    cost = pl.CostEstimate(flops=2 * N * P * K * K * Cin * Cout,
                           transcendentals=N * Cout,
                           bytes_accessed=bytes_accessed)

    out = pl.pallas_call(
        kernel,
        out_shape=jax.ShapeDtypeStruct((N, Cout, P), out_dtype),
        grid_spec=pltpu.PrefetchScalarGridSpec(
            num_scalar_prefetch=0,
            grid=(N // B,),
            in_specs=[
                pl.BlockSpec((B, Hp, Wp, Cin), lambda n: (n, 0, 0, 0)),
                pl.BlockSpec((Cout, K * K * Cin), lambda n: (0, 0)),
            ],
            out_specs=pl.BlockSpec((B, Cout, P), lambda n: (n, 0, 0)),
        ),
        compiler_params=pltpu.CompilerParams(
            # Shards the batch-step axis across v7x's two TensorCores;
            # effectively documentation-only on single-TC v5e/v6e.
            dimension_semantics=("parallel",),
            # Sized with headroom for v7x's 64 MiB physical VMEM.
            vmem_limit_bytes=32 * 1024 * 1024,
        ),
        cost_estimate=cost,
    )(xp, w)

    # (N, Cout, P) -> (N, Cout, Ho, Wo): pure reshape, no transpose needed.
    return out.reshape(N, Cout, Ho, Wo)


def reference(x_nchw, weight, bias, *, stride=1, padding=1, use_act=True):
    """Pure-JAX f32 reference (lax.conv + bias + instance norm + relu)."""
    y = jax.lax.conv_general_dilated(
        x_nchw, weight,
        window_strides=(stride, stride),
        padding=[(padding, padding), (padding, padding)],
        dimension_numbers=("NCHW", "OIHW", "NCHW"),
    ) + bias[None, :, None, None]
    mean = jnp.mean(y, axis=(2, 3), keepdims=True)
    var = jnp.mean((y - mean) ** 2, axis=(2, 3), keepdims=True)
    y = (y - mean) * jax.lax.rsqrt(var + EPS)
    return jnp.maximum(y, 0.0) if use_act else y


if __name__ == "__main__":
    # ConvBlock(in_chans=4, out_chans=8, down=True, use_act=True,
    #           kernel_size=3, stride=1, padding=1)
    N, Cin, H, W = 2, 4, 16, 16
    Cout, K = 8, 3
    stride, padding = 1, 1

    key = jax.random.PRNGKey(0)
    kx, kw, kb = jax.random.split(key, 3)

    x = jax.random.normal(kx, (N, Cin, H, W), dtype=jnp.float32)
    fan_in = Cin * K * K
    bound = 1.0 / (fan_in ** 0.5)
    weight = jax.random.uniform(kw, (Cout, Cin, K, K), jnp.float32, -bound, bound)
    bias = jax.random.uniform(kb, (Cout,), jnp.float32, -bound, bound)

    ref = reference(x, weight, bias, stride=stride, padding=padding, use_act=True)

    # f32 path: tight numerical validation of the kernel logic (also checks the
    # bias-cancellation claim, since the reference still applies the bias).
    out_f32 = conv_block(x, weight, bias, stride=stride, padding=padding,
                         use_act=True, compute_dtype=jnp.float32,
                         out_dtype=jnp.float32)
    out_f32 = jax.block_until_ready(out_f32)
    assert out_f32.shape == (N, Cout, H, W)
    assert jnp.allclose(out_f32, ref, atol=1e-4, rtol=1e-4), "f32 mismatch vs reference"

    # bf16 fast path: bf16 MXU operands + bf16 output store, f32 accumulation
    # and f32 norm math.  Tolerance reflects bf16 operand/output rounding on
    # unit-variance normalized outputs.
    out_bf16 = conv_block(x, weight, bias, stride=stride, padding=padding,
                          use_act=True, compute_dtype=jnp.bfloat16,
                          out_dtype=jnp.bfloat16)
    out_bf16 = jax.block_until_ready(out_bf16)
    assert out_bf16.shape == (N, Cout, H, W)
    assert jnp.allclose(out_bf16.astype(jnp.float32), ref,
                        atol=3e-2, rtol=3e-2), "bf16 mismatch vs reference"

    print("KERNEL_OK")
</pallas_src>

<mosaic_0001>
module attributes {stable_mosaic.version = 11 : i64} {
  func.func @convblock_kernel(%arg0: i32, %arg1: memref<1x18x18x4xf32, #tpu.memory_space<vmem>>, %arg2: memref<8x36xf32, #tpu.memory_space<vmem>>, %arg3: memref<1x8x256xf32, #tpu.memory_space<vmem>>) attributes {dimension_semantics = [#tpu.dimension_semantics<parallel>], iteration_bounds = array<i64: 2>, scalar_prefetch = 0 : i64, scratch_operands = 0 : i64, tpu.core_type = #tpu.core_type<tc>, window_params = [{transform_indices = @transform_0, window_bounds = array<i64: 1, 18, 18, 4>}, {pipeline_mode = #tpu.pipeline_mode<synchronous>, transform_indices = @transform_1, window_bounds = array<i64: 8, 36>}, {transform_indices = @transform_2, window_bounds = array<i64: 1, 8, 256>}]} {
    %c0 = arith.constant 0 : index
    %c0_0 = arith.constant 0 : index
    %0 = vector.load %arg2[%c0, %c0_0] : memref<8x36xf32, #tpu.memory_space<vmem>>, vector<8x36xf32>
    %c0_1 = arith.constant 0 : index
    %c0_2 = arith.constant 0 : index
    %c0_3 = arith.constant 0 : index
    %c0_4 = arith.constant 0 : index
    %1 = vector.load %arg1[%c0_1, %c0_2, %c0_3, %c0_4] : memref<1x18x18x4xf32, #tpu.memory_space<vmem>>, vector<1x18x18x4xf32>
    %2 = vector.shape_cast %1 : vector<1x18x18x4xf32> to vector<18x18x4xf32>
    %3 = vector.extract_strided_slice %2 {offsets = [0, 0, 0], sizes = [16, 16, 4], strides = [1, 1, 1]} : vector<18x18x4xf32> to vector<16x16x4xf32>
    %4 = vector.shape_cast %3 : vector<16x16x4xf32> to vector<256x4xf32>
    %5 = vector.extract_strided_slice %2 {offsets = [0, 1, 0], sizes = [16, 16, 4], strides = [1, 1, 1]} : vector<18x18x4xf32> to vector<16x16x4xf32>
    %6 = vector.shape_cast %5 : vector<16x16x4xf32> to vector<256x4xf32>
    %7 = vector.extract_strided_slice %2 {offsets = [0, 2, 0], sizes = [16, 16, 4], strides = [1, 1, 1]} : vector<18x18x4xf32> to vector<16x16x4xf32>
    %8 = vector.shape_cast %7 : vector<16x16x4xf32> to vector<256x4xf32>
    %9 = vector.extract_strided_slice %2 {offsets = [1, 0, 0], sizes = [16, 16, 4], strides = [1, 1, 1]} : vector<18x18x4xf32> to vector<16x16x4xf32>
    %10 = vector.shape_cast %9 : vector<16x16x4xf32> to vector<256x4xf32>
    %11 = vector.extract_strided_slice %2 {offsets = [1, 1, 0], sizes = [16, 16, 4], strides = [1, 1, 1]} : vector<18x18x4xf32> to vector<16x16x4xf32>
    %12 = vector.shape_cast %11 : vector<16x16x4xf32> to vector<256x4xf32>
    %13 = vector.extract_strided_slice %2 {offsets = [1, 2, 0], sizes = [16, 16, 4], strides = [1, 1, 1]} : vector<18x18x4xf32> to vector<16x16x4xf32>
    %14 = vector.shape_cast %13 : vector<16x16x4xf32> to vector<256x4xf32>
    %15 = vector.extract_strided_slice %2 {offsets = [2, 0, 0], sizes = [16, 16, 4], strides = [1, 1, 1]} : vector<18x18x4xf32> to vector<16x16x4xf32>
    %16 = vector.shape_cast %15 : vector<16x16x4xf32> to vector<256x4xf32>
    %17 = vector.extract_strided_slice %2 {offsets = [2, 1, 0], sizes = [16, 16, 4], strides = [1, 1, 1]} : vector<18x18x4xf32> to vector<16x16x4xf32>
    %18 = vector.shape_cast %17 : vector<16x16x4xf32> to vector<256x4xf32>
    %19 = vector.extract_strided_slice %2 {offsets = [2, 2, 0], sizes = [16, 16, 4], strides = [1, 1, 1]} : vector<18x18x4xf32> to vector<16x16x4xf32>
    %20 = vector.shape_cast %19 : vector<16x16x4xf32> to vector<256x4xf32>
    %21 = tpu.concatenate %4, %6, %8, %10, %12, %14, %16, %18, %20 in 1 : vector<256x4xf32>, vector<256x4xf32>, vector<256x4xf32>, vector<256x4xf32>, vector<256x4xf32>, vector<256x4xf32>, vector<256x4xf32>, vector<256x4xf32>, vector<256x4xf32> -> vector<256x36xf32>
    %cst = arith.constant dense<0.000000e+00> : vector<8x256xf32>
    %22 = tpu.matmul %0, %21, %cst {dimension_numbers = #tpu.dot_dimension_numbers<[1], [1], [0], [0], [0, 0, 1, 0], [], []>} : vector<8x36xf32>, vector<256x36xf32>, vector<8x256xf32> -> vector<8x256xf32>
    %cst_5 = arith.constant dense<0.000000e+00> : vector<8xf32>
    %23 = vector.multi_reduction <add>, %22, %cst_5 [1] : vector<8x256xf32> to vector<8xf32>
    %24 = vector.shape_cast %23 : vector<8xf32> to vector<8x1xf32>
    %cst_6 = arith.constant 2.560000e+02 : f32
    %25 = vector.broadcast %cst_6 : f32 to vector<8x1xf32>
    %26 = arith.divf %24, %25 : vector<8x1xf32>
    %27 = vector.broadcast %26 : vector<8x1xf32> to vector<8x256xf32>
    %28 = arith.subf %22, %27 : vector<8x256xf32>
    %29 = arith.mulf %28, %28 : vector<8x256xf32>
    %cst_7 = arith.constant dense<0.000000e+00> : vector<8xf32>
    %30 = vector.multi_reduction <add>, %29, %cst_7 [1] : vector<8x256xf32> to vector<8xf32>
    %31 = vector.shape_cast %30 : vector<8xf32> to vector<8x1xf32>
    %cst_8 = arith.constant 2.560000e+02 : f32
    %32 = vector.broadcast %cst_8 : f32 to vector<8x1xf32>
    %33 = arith.divf %31, %32 : vector<8x1xf32>
    %cst_9 = arith.constant 9.99999974E-6 : f32
    %34 = vector.broadcast %cst_9 : f32 to vector<8x1xf32>
    %35 = arith.addf %33, %34 : vector<8x1xf32>
    %36 = math.rsqrt %35 : vector<8x1xf32>
    %37 = vector.broadcast %36 : vector<8x1xf32> to vector<8x256xf32>
    %38 = arith.mulf %28, %37 : vector<8x256xf32>
    %cst_10 = arith.constant 0.000000e+00 : f32
    %39 = vector.broadcast %cst_10 : f32 to vector<8x256xf32>
    %40 = arith.maximumf %38, %39 : vector<8x256xf32>
    %c0_11 = arith.constant 0 : index
    %c0_12 = arith.constant 0 : index
    %c0_13 = arith.constant 0 : index
    %41 = vector.load %arg3[%c0_11, %c0_12, %c0_13] : memref<1x8x256xf32, #tpu.memory_space<vmem>>, vector<1x8x256xf32>
    %42 = vector.shape_cast %41 : vector<1x8x256xf32> to vector<8x256xf32>
    %43 = vector.shape_cast %40 : vector<8x256xf32> to vector<1x8x256xf32>
    tpu.vector_store %arg3[%c0_11, %c0_12, %c0_13], %43 {strides = array<i32>} : memref<1x8x256xf32, #tpu.memory_space<vmem>>, vector<1x8x256xf32>,
    return
  }
  func.func @transform_0(%arg0: i32) -> (i32, i32, i32, i32) {
    %c0_i32 = arith.constant 0 : i32
    %c0_i32_0 = arith.constant 0 : i32
    %c0_i32_1 = arith.constant 0 : i32
    %c0_i32_2 = arith.constant 0 : i32
    return %arg0, %c0_i32, %c0_i32_0, %c0_i32_1 : i32, i32, i32, i32
  }
  func.func @transform_1(%arg0: i32) -> (i32, i32) {
    %c0_i32 = arith.constant 0 : i32
    %c0_i32_0 = arith.constant 0 : i32
    %c0_i32_1 = arith.constant 0 : i32
    return %c0_i32, %c0_i32_0 : i32, i32
  }
  func.func @transform_2(%arg0: i32) -> (i32, i32, i32) {
    %c0_i32 = arith.constant 0 : i32
    %c0_i32_0 = arith.constant 0 : i32
    %c0_i32_1 = arith.constant 0 : i32
    return %arg0, %c0_i32, %c0_i32_0 : i32, i32, i32
  }
}

</mosaic_0001>

<bundles_post_ra>
// kernel: tpu_custom_call.1
= control target key start
LH: loop header
LB: loop body
LE: loop exit
PB: predicated region body
PF: predicated region fallthrough
CT: control target
= control target key end

     0   :  { %7 = vsyncpa [#allocation3], 0  ;;  %s3893_s0 = inlined_call_operand.vmem [shape: f32[2,18,18,4], index: 0, kind: input, shape index: {}]   ;;  %s3894_s1 = inlined_call_operand.vmem [shape: f32[8,36], index: 1, kind: input, shape index: {}]   ;;  %s3895_s2 = inlined_call_operand.hbm [shape: f32[2,8,256], index: 2, kind: output, shape index: {}]  }
   0x1   :  { %9 = vsyncpa [#allocation3 + $0x1], 0  ;;  %s2664_s9 = smov 0   ;;  %s2666_s10 = smov 0  }
   0x2   :  { %s2668_s11 = smov 0   ;;  %s2670_s12 = smov 0  }
   0x3 LB: > { %s2685_s13 = sadd.s32 4294967295, %s2638_s12   ;;  %s1731_s14 = sadd.s32 4294967294, %s2638_s12   ;;  %s2638_s12 = sphi %s2670_s12, %s3903_s12   ;;  %s2634_s11 = sphi %s2668_s11, %s3902_s11   ;;  %s2630_s10 = sphi %s2666_s10, %s3901_s10   ;;  %s2626_s9 = sphi %s2664_s9, %s3900_s9  }
   0x4   : > { %s2689_s15 = sadd.s32 1, %s2638_s12   ;;  %s69_s16 = sadd.s32 1, %s2634_s11 }
   0x5   : > { %s66_s17 = ssub.s32 %s2638_s12, %s2689_s15  ;;  %p79_p0 = scmp.ne.s32.totalorder %s2634_s11, %s2630_s10 }
   0x6   : > { %p67_p1 = scmp.eq.s32.totalorder %s66_s17, 0  ;;  %p80_p2 = scmp.eq.s32.totalorder %s2685_s13, 1 }
   0x7   : > { %p85_p3 = scmp.ne.s32.totalorder %s2630_s10, %s2626_s9  ;;  %p86_p4 = scmp.eq.s32.totalorder %s1731_s14, 1 }
   0x8   : > { %s2700_s18 = scalar_select %p67_p1, %s2634_s11, %s69_s16  }
   0x9   : > { %p2702_p5 = por %p80_p2, %p79_p0  ;;  %p2706_p6 = por %p86_p4, %p85_p3 }
   0xa   : > { %p1734_p7 = scmp.ge.s32.totalorder %s2638_s12, 1  ;;  %p115_p8 = scmp.lt.s32.totalorder %s2638_s12, 3 }
   0xc   : > { %p116_p9 = pnand %p1734_p7, %p115_p8 }
   0xd   : > { %p137_p10 = scmp.lt.s32.totalorder (!%p116_p9), %s2685_s13, 1  ;;  %vm245_vm0 = vcmask (!%p116_p9), 1046528   ;;  %vm326_vm1 = vcmask (!%p116_p9), 1045504   ;;  %s2640_s26 = smov (!%p116_p9), 4   ;;  %vm1201_vm2 = vcmask (!%p116_p9), 31744   ;;  %vm1234_vm3 = vcmask (!%p116_p9), 64512  }
   0xe   : > { %119 = sbr.rel (%p116_p9) target bundleno = 954 (0x3ba), region = 28  ;;  %s2641_s27 = smov (!%p116_p9), 8   ;;  %vm1267_vm4 = vcmask (!%p116_p9), 97280   ;;  %vm1300_vm5 = vcmask (!%p116_p9), 130048   ;;  %vm1333_vm6 = vcmask (!%p116_p9), 162816   ;;  %vm1366_vm7 = vcmask (!%p116_p9), 195584  }
   0xf   : > { %s2642_s28 = smov (!%p116_p9), 12   ;;  %s2643_s29 = smov (!%p116_p9), 16   ;;  %vm1399_vm8 = vcmask (!%p116_p9), 228352   ;;  %vm1432_vm9 = vcmask (!%p116_p9), 261120   ;;  %vm1465_vm10 = vcmask (!%p116_p9), 293888  }
  0x10   : > { %s2644_s30 = smov (!%p116_p9), 20   ;;  %s2645_s3 = smov (!%p116_p9), 24   ;;  %vm3119_vm11 = vmpackc.low (!%p116_p9), %vm1465_vm10, %vm1465_vm10 }
  0x11   : > { %s2646_s4 = smov (!%p116_p9), 28   ;;  %s2647_s5 = smov (!%p116_p9), 32  }
  0x12   : > { %s134_s8 = sand.u32 (!%p116_p9), 1, %s2630_s10   ;;  %s1775_s16 = sshll.u32 (!%p116_p9), %s2685_s13, 8 }
  0x13   : > { %s1735_s14 = sshll.u32 (!%p116_p9), %s134_s8, 4  ;;  %s3851_s24 = scalar_lea.hbm (!%p116_p9), %s3895_s2, %s1775_s16 }
  0x14   : > { %s136_s17 = scalar_lea.vmem (!%p116_p9), [#allocation2], %s1735_s14 }
  0x15   : > { %s138_s21 = scalar_select %p137_p10, %s2685_s13, 1 }
  0x17   : > { %s1858_s22 = smul.u32 432, %s138_s21  ;;  %s1672_s21 = sshll.u32 %s136_s17, 4  ;;  %s3853_s21 = int_to_ptr.vmem [resolvable:$true] %s1672_s21 }
  0x18   : > { %s2576_s13 = scalar_lea.vmem %s3853_s21, 256 }
  0x19   : > { %s2717_s25 = scalar_lea.vmem %s3893_s0, %s1858_s22  ;;  %p2577_p11 = scmp.ne.s32.totalorder %s3853_s21, %s2576_s13 }
  0x1a   : > { %v2720_v0 = vld [vmem:[%s2717_s25 + $0x30] sm:$0xff]  ;;  %v2723_v1 = vld [vmem:[%s2717_s25 + $0x38] sm:$0xff]  ;;  %v2726_v2 = vld [vmem:[%s2717_s25 + $0x40] sm:$0x3] }
  0x1b   : > { %v256_v3 = vrot.slane %v2720_v0, 1  ;;  %v257_v4 = vrot.slane %v2723_v1, 1  ;;  %v259_v5 = vrot.slane %v2726_v2, 1  ;;  %v2732_v6 = vld [vmem:[%s2717_s25] sm:$0xff]  ;;  %v2735_v7 = vld [vmem:[%s2717_s25 + $0x8] sm:$0xff]  ;;  %v2750_v18 = vld [vmem:[%s2717_s25 + $0x18] sm:$0xff]  ;;  %p2578_p12 = pnand %p2577_p11, %p2702_p5 }
  0x1c   : > { %v145_v8 = vld [vmem:[%s2717_s25 + $0x10] sm:$0x3]  ;;  %v246_v9 = vrot.slane %v2732_v6, 1  ;;  %v247_v10 = vrot.slane %v2735_v7, 1  ;;  %v2741_v11 = vld [vmem:[%s2717_s25 + $0xc0] sm:$0xff]  ;;  %v2744_v12 = vld [vmem:[%s2717_s25 + $0xc8] sm:$0xff] }
  0x1d   : > { %v258_v13 = vsel %vm245_vm0, %v256_v3, %v257_v4  ;;  %v260_v14 = vsel %vm245_vm0, %v257_v4, %v259_v5  ;;  %v249_v15 = vrot.slane %v145_v8, 1  ;;  %v330_v16 = vrot.slane %v145_v8, 2  ;;  %v169_v17 = vld [vmem:[%s2717_s25 + $0xd0] sm:$0x3]  ;;  %v2753_v19 = vld [vmem:[%s2717_s25 + $0x20] sm:$0xff]  ;;  %v2780_v44 = vld [vmem:[%s2717_s25 + $0xd8] sm:$0xff]  ;;  %p2579_p13 = pneg %p2578_p12 }
  0x1e   : > { %v2755_v20 = vpack.i.bf16 %v260_v14, %v258_v13  ;;  %v248_v21 = vsel %vm245_vm0, %v246_v9, %v247_v10  ;;  %v286_v22 = vrot.slane %v2741_v11, 1  ;;  %v287_v23 = vrot.slane %v2744_v12, 1  ;;  %v148_v24 = vld [vmem:[%s2717_s25 + $0x28] sm:$0x3]  ;;  %v2783_v45 = vld [vmem:[%s2717_s25 + $0xe0] sm:$0xff]  ;;  %v173_v13 = vld [vmem:[%s2717_s25 + $0xf0] sm:$0xff] }
  0x1f   : > { %v250_v25 = vsel %vm245_vm0, %v247_v10, %v249_v15  ;;  %v289_v26 = vrot.slane %v169_v17, 1  ;;  %v251_v27 = vrot.slane %v2750_v18, 1  ;;  %v252_v28 = vrot.slane %v2753_v19, 1  ;;  %v172_v49 = vld [vmem:[%s2717_s25 + $0xe8] sm:$0x3]  ;;  %v174_v14 = vld [vmem:[%s2717_s25 + $0xf8] sm:$0xff] }
  0x20   : > { %1917 = vrot.lane.b32.xlu1 %v2755_v20, %s2640_s26  ;;  %v1906_v29 = vpack.i.bf16 %v250_v25, %v248_v21  ;;  %v288_v30 = vsel %vm245_vm0, %v286_v22, %v287_v23  ;;  %v254_v31 = vrot.slane %v148_v24, 1  ;;  %v327_v32 = vrot.slane %v2732_v6, 2  ;;  %v175_v15 = vld [vmem:[%s2717_s25 + $0x100] sm:$0x3] }
  0x21   : > { %v290_v33 = vsel %vm245_vm0, %v287_v23, %v289_v26  ;;  %v253_v34 = vsel %vm245_vm0, %v251_v27, %v252_v28  ;;  %v328_v35 = vrot.slane %v2735_v7, 2  ;;  %v367_v36 = vrot.slane %v2741_v11, 2 }
  0x22   : > { %1907 = vrot.lane.b32.xlu0 %v1906_v29, %s2640_s26  ;;  %v2773_v37 = vpack.i.bf16 %v290_v33, %v288_v30  ;;  %v255_v38 = vsel %vm245_vm0, %v252_v28, %v254_v31  ;;  %v368_v39 = vrot.slane %v2744_v12, 2  ;;  %v370_v40 = vrot.slane %v169_v17, 2 }
  0x23   : > { %v1911_v41 = vpack.i.bf16 %v255_v38, %v253_v34  ;;  %v329_v42 = vsel %vm326_vm1, %v327_v32, %v328_v35  ;;  %v331_v43 = vsel %vm326_vm1, %v328_v35, %v330_v16  ;;  %v291_v51 = vrot.slane %v2780_v44, 1 }
  0x24   : > { %1922 = vrot.lane.b32.xlu1 %v2773_v37, %s2640_s26  ;;  %v1936_v46 = vpack.i.bf16 %v331_v43, %v329_v42  ;;  %v369_v47 = vsel %vm326_vm1, %v367_v36, %v368_v39  ;;  %v371_v48 = vsel %vm326_vm1, %v368_v39, %v370_v40  ;;  %v292_v52 = vrot.slane %v2783_v45, 1  ;;  %v177_v39 = vld [vmem:[%s2717_s25 + $0x110] sm:$0xff]  ;;  %v178_v40 = vld [vmem:[%s2717_s25 + $0x118] sm:$0x3] }
  0x25   : > { %v2791_v50 = vpack.i.bf16 %v371_v48, %v369_v47  ;;  %v294_v53 = vrot.slane %v172_v49, 1  ;;  %v1941_v54 = vpack.i.bf16 %v2753_v19, %v2750_v18  ;;  %v332_v55 = vrot.slane %v2750_v18, 2  ;;  %v152_v47 = vld [vmem:[%s2717_s25 + $0x48] sm:$0xff]  ;;  %v153_v48 = vld [vmem:[%s2717_s25 + $0x50] sm:$0xff] }
  0x26   : > { %1912 = vrot.lane.b32.xlu0 %v1911_v41, %s2640_s26  ;;  %v333_v56 = vrot.slane %v2753_v19, 2  ;;  %v335_v57 = vrot.slane %v148_v24, 2  ;;  %v1931_v58 = vpack.i.bf16 %v2783_v45, %v2780_v44  ;;  %v293_v59 = vsel %vm245_vm0, %v291_v51, %v292_v52 }
  0x27   : > { %v295_v60 = vsel %vm245_vm0, %v292_v52, %v294_v53  ;;  %v372_v61 = vrot.slane %v2780_v44, 2  ;;  %v373_v62 = vrot.slane %v2783_v45, 2  ;;  %v375_v63 = vrot.slane %v172_v49, 2  ;;  %v154_v52 = vld [vmem:[%s2717_s25 + $0x58] sm:$0x3] }
  0x28   : > { %1937 = vrot.lane.b32.xlu1 %v1936_v46, %s2641_s27  ;;  %v334_v3 = vsel %vm326_vm1, %v332_v55, %v333_v56  ;;  %v336_v4 = vsel %vm326_vm1, %v333_v56, %v335_v57  ;;  %v2812_v5 = vpack.i.bf16 %v295_v60, %v293_v59  ;;  %v296_v17 = vrot.slane %v173_v13, 1 }
  0x29   : > { %v374_v8 = vsel %vm326_vm1, %v372_v61, %v373_v62  ;;  %v376_v9 = vsel %vm326_vm1, %v373_v62, %v375_v63  ;;  %v1961_v10 = vpack.i.bf16 %v336_v4, %v334_v3  ;;  %v297_v21 = vrot.slane %v174_v14, 1 }
  0x2a   : > { %1927 = vrot.lane.b32.xlu0 %v2791_v50, %s2641_s27  ;;  %v2822_v16 = vpack.i.bf16 %v376_v9, %v374_v8  ;;  %v299_v22 = vrot.slane %v175_v15, 1  ;;  %v1971_v23 = vpack.i.bf16 %v2723_v1, %v2720_v0  ;;  %v1966_v24 = vpack.i.bf16 %v174_v14, %v173_v13 }
  0x2b   : > { %v377_v25 = vrot.slane %v173_v13, 2  ;;  %v298_v26 = vsel %vm245_vm0, %v296_v17, %v297_v21  ;;  %v378_v28 = vrot.slane %v174_v14, 2  ;;  %v380_v29 = vrot.slane %v175_v15, 2  ;;  %v155_v17 = vld [vmem:[%s2717_s25 + $0x60] sm:$0xff] }
  0x2c   : > { %1942 = vrot.lane.b32.xlu1 %v1941_v54, %s2642_s28  ;;  %v300_v27 = vsel %vm245_vm0, %v297_v21, %v299_v22  ;;  %v340_v30 = vrot.slane %v2726_v2, 2  ;;  %v337_v34 = vrot.slane %v2720_v0, 2  ;;  %v338_v35 = vrot.slane %v2723_v1, 2  ;;  %v176_v1 = vld [vmem:[%s2717_s25 + $0x108] sm:$0xff]  ;;  %v157_v22 = vld [vmem:[%s2717_s25 + $0x70] sm:$0x3] }
  0x2d   : > { %v1976_v31 = vpack.i.bf16 %v300_v27, %v298_v26  ;;  %v379_v32 = vsel %vm326_vm1, %v377_v25, %v378_v28  ;;  %v381_v33 = vsel %vm326_vm1, %v378_v28, %v380_v29  ;;  %v302_v42 = vrot.slane %v177_v39, 1  ;;  %v156_v21 = vld [vmem:[%s2717_s25 + $0x68] sm:$0xff]  ;;  %v181_v25 = vld [vmem:[%s2717_s25 + $0x130] sm:$0x3] }
  0x2e   : > { %1932 = vrot.lane.b32.xlu0 %v1931_v58, %s2642_s28  ;;  %v1986_v2 = vpack.i.bf16 %v381_v33, %v379_v32  ;;  %v339_v36 = vsel %vm326_vm1, %v337_v34, %v338_v35  ;;  %v341_v38 = vsel %vm326_vm1, %v338_v35, %v340_v30  ;;  %v304_v43 = vrot.slane %v178_v40, 1 }
  0x2f   : > { %v1996_v0 = vpack.i.bf16 %v341_v38, %v339_v36  ;;  %v2041_v46 = vpack.i.bf16 %v177_v39, %v176_v1  ;;  %v382_v49 = vrot.slane %v176_v1, 2  ;;  %v383_v51 = vrot.slane %v177_v39, 2 }
  0x30   : > { %1952 = vrot.lane.b32.xlu1 %v1911_v41, %s2643_s29  ;;  %v301_v41 = vrot.slane %v176_v1, 1  ;;  %v305_v54 = vsel %vm245_vm0, %v302_v42, %v304_v43  ;;  %v385_v55 = vrot.slane %v178_v40, 2  ;;  %v261_v56 = vrot.slane %v152_v47, 1 }
  0x31   : > { %v262_v57 = vrot.slane %v153_v48, 1  ;;  %v264_v58 = vrot.slane %v154_v52, 1  ;;  %v384_v60 = vsel %vm326_vm1, %v382_v49, %v383_v51  ;;  %v342_v62 = vrot.slane %v152_v47, 2 }
  0x32   : > { %1947 = vrot.lane.b32.xlu0 %v2812_v5, %s2643_s29  ;;  %v303_v53 = vsel %vm245_vm0, %v301_v41, %v302_v42  ;;  %v386_v61 = vsel %vm326_vm1, %v383_v51, %v385_v55  ;;  %v343_v63 = vrot.slane %v153_v48, 2  ;;  %v345_v3 = vrot.slane %v154_v52, 2  ;;  %v160_v55 = vld [vmem:[%s2717_s25 + $0x88] sm:$0x3] }
  0x33   : > { %v2865_v59 = vpack.i.bf16 %v305_v54, %v303_v53  ;;  %v2046_v4 = vpack.i.bf16 %v153_v48, %v152_v47  ;;  %v263_v8 = vsel %vm245_vm0, %v261_v56, %v262_v57  ;;  %v2061_v9 = vpack.i.bf16 %v386_v61, %v384_v60  ;;  %v158_v53 = vld [vmem:[%s2717_s25 + $0x78] sm:$0xff]  ;;  %v159_v54 = vld [vmem:[%s2717_s25 + $0x80] sm:$0xff] }
  0x34   : > { %1962 = vrot.lane.b32.xlu1 %v1961_v10, %s2644_s30  ;;  %v346_v13 = vsel %vm326_vm1, %v343_v63, %v345_v3  ;;  %v266_v26 = vrot.slane %v155_v17, 1  ;;  %v267_v27 = vrot.slane %v156_v21, 1  ;;  %v269_v28 = vrot.slane %v157_v22, 1  ;;  %v182_v56 = vld [vmem:[%s2717_s25 + $0x138] sm:$0xff] }
  0x35   : > { %v2121_v32 = vpack.i.bf16 %v156_v21, %v155_v17  ;;  %v390_v1 = vrot.slane %v181_v25, 2  ;;  %v347_v43 = vrot.slane %v155_v17, 2  ;;  %v350_v47 = vrot.slane %v157_v22, 2 }
  0x36   : > { %1957 = vrot.lane.b32.xlu0 %v2822_v16, %s2644_s30  ;;  %v268_v33 = vsel %vm245_vm0, %v266_v26, %v267_v27  ;;  %v270_v34 = vsel %vm245_vm0, %v267_v27, %v269_v28  ;;  %v272_v60 = vrot.slane %v159_v54, 1  ;;  %v274_v61 = vrot.slane %v160_v55, 1 }
  0x37   : > { %v2901_v39 = vpack.i.bf16 %v270_v34, %v268_v33  ;;  %v352_v28 = vrot.slane %v158_v53, 2 }
  0x38   : > { %1972 = vrot.lane.b32.xlu1 %v1971_v23, %s2645_s3 }
  0x3a   : > { %1967 = vrot.lane.b32.xlu0 %v1966_v24, %s2645_s3 }
  0x3c   : > { %1982 = vrot.lane.b32.xlu1 %v2755_v20, %s2646_s4 }
  0x3e   : > { %1977 = vrot.lane.b32.xlu0 %v1976_v31, %s2646_s4 }
  0x40   : > { %1992 = vrot.lane.b32.xlu1 %v2812_v5, %s2640_s26 }
  0x42   : > { %1987 = vrot.lane.b32.xlu0 %v1986_v2, %s2647_s5 }
  0x44   : > { %2002 = vrot.lane.b32.xlu1 %v2822_v16, %s2641_s27 }
  0x46   : > { %1997 = vrot.lane.b32.xlu0 %v1996_v0, %s2647_s5 }
  0x48   : > { %2012 = vrot.lane.b32.xlu1 %v1966_v24, %s2642_s28  ;;  %v180_v24 = vld [vmem:[%s2717_s25 + $0x128] sm:$0xff] }
  0x49   : > { %v307_v30 = vrot.slane %v180_v24, 1  ;;  %v388_v36 = vrot.slane %v180_v24, 2 }
  0x4a   : > { %2007 = vrot.lane.b32.xlu0 %v1961_v10, %s2641_s27  ;;  %v344_v10 = vsel %vm326_vm1, %v342_v62, %v343_v63  ;;  %v311_v62 = vrot.slane %v182_v56, 1 }
  0x4b   : > { %v2071_v15 = vpack.i.bf16 %v346_v13, %v344_v10  ;;  %v391_v42 = vsel %vm326_vm1, %v388_v36, %v390_v1  ;;  %v392_v13 = vrot.slane %v182_v56, 2  ;;  %v2993_v1 = vld [vmem:[%s2717_s25 + $0x98] sm:$0xff] }
  0x4c   : > { %2022 = vrot.lane.b32.xlu1 %v1976_v31, %s2643_s29 }
  0x4e   : > { %2017 = vrot.lane.b32.xlu0 %v1971_v23, %s2642_s28  ;;  %v179_v23 = vld [vmem:[%s2717_s25 + $0x120] sm:$0xff] }
  0x4f   : > { %v306_v29 = vrot.slane %v179_v23, 1  ;;  %v2116_v35 = vpack.i.bf16 %v180_v24, %v179_v23 }
  0x50   : > { %2032 = vrot.lane.b32.xlu1 %v1986_v2, %s2644_s30 }
  0x51   : > { %v308_v38 = vsel %vm245_vm0, %v306_v29, %v307_v30  ;;  %v353_v29 = vrot.slane %v159_v54, 2 }
  0x52   : > { %2027 = vrot.lane.b32.xlu0 %v2755_v20, %s2643_s29  ;;  %v265_v20 = vsel %vm245_vm0, %v262_v57, %v264_v58  ;;  %v183_v57 = vld [vmem:[%s2717_s25 + $0x140] sm:$0xff]  ;;  %v184_v58 = vld [vmem:[%s2717_s25 + $0x148] sm:$0x3] }
  0x53   : > { %v2056_v14 = vpack.i.bf16 %v265_v20, %v263_v8  ;;  %v312_v63 = vrot.slane %v183_v57, 1  ;;  %v314_v3 = vrot.slane %v184_v58, 1  ;;  %v275_v20 = vsel %vm245_vm0, %v272_v60, %v274_v61 }
  0x54   : > { %2042 = vrot.lane.b32.xlu1 %v2041_v46, %s2645_s3  ;;  %v2949_v10 = vpack.i.bf16 %v183_v57, %v182_v56  ;;  %v354_v34 = vsel %vm326_vm1, %v352_v28, %v353_v29 }
  0x55   : > { %v315_v17 = vsel %vm245_vm0, %v312_v63, %v314_v3 }
  0x56   : > { %2037 = vrot.lane.b32.xlu0 %v1996_v0, %s2644_s30 }
  0x58   : > { %2052 = vrot.lane.b32.xlu1 %v2865_v59, %s2646_s4 }
  0x5a   : > { %2047 = vrot.lane.b32.xlu0 %v2046_v4, %s2645_s3 }
  0x5c   : > { %2062 = vrot.lane.b32.xlu1 %v2061_v9, %s2647_s5 }
  0x5e   : > { %2057 = vrot.lane.b32.xlu0 %v2056_v14, %s2646_s4 }
  0x60   : > { %2072 = vrot.lane.b32.xlu1 %v2071_v15, %s2647_s5 }
  0x62   : > { %2067 = vrot.lane.b32.xlu0 %v1976_v31, %s2640_s26  ;;  %v309_v31 = vrot.slane %v181_v25, 1 }
  0x64   : > { %2082 = vrot.lane.b32.xlu1 %v1996_v0, %s2641_s27  ;;  %v310_v0 = vsel %vm245_vm0, %v307_v30, %v309_v31  ;;  %v355_v30 = vrot.slane %v160_v55, 2 }
  0x65   : > { %v2904_v40 = vpack.i.bf16 %v310_v0, %v308_v38  ;;  %v2990_v0 = vld [vmem:[%s2717_s25 + $0x90] sm:$0xff] }
  0x66   : > { %2077 = vrot.lane.b32.xlu0 %v1986_v2, %s2641_s27  ;;  %v387_v2 = vrot.slane %v179_v23, 2 }
  0x68   : > { %2092 = vrot.lane.b32.xlu1 %v2046_v4, %s2642_s28  ;;  %v389_v41 = vsel %vm326_vm1, %v387_v2, %v388_v36  ;;  %v2941_v4 = vpack.i.bf16 %v159_v54, %v158_v53 }
  0x69   : > { %v2912_v48 = vpack.i.bf16 %v391_v42, %v389_v41  ;;  %v2996_v41 = vld [vmem:[%s2717_s25 + $0xa0] sm:$0x3]  ;;  %v185_v42 = vld [vmem:[%s2717_s25 + $0x150] sm:$0xff] }
  0x6a   : > { %2087 = vrot.lane.b32.xlu0 %v2041_v46, %s2642_s28  ;;  %v348_v46 = vrot.slane %v156_v21, 2  ;;  %v395_v21 = vrot.slane %v184_v58, 2  ;;  %v316_v54 = vrot.slane %v185_v42, 1 }
  0x6c   : > { %2102 = vrot.lane.b32.xlu1 %v2056_v14, %s2643_s29  ;;  %v349_v49 = vsel %vm326_vm1, %v347_v43, %v348_v46  ;;  %v351_v51 = vsel %vm326_vm1, %v348_v46, %v350_v47  ;;  %v186_v43 = vld [vmem:[%s2717_s25 + $0x158] sm:$0xff]  ;;  %v187_v46 = vld [vmem:[%s2717_s25 + $0x160] sm:$0x3] }
  0x6d   : > { %v2920_v52 = vpack.i.bf16 %v351_v51, %v349_v49  ;;  %v277_v49 = vrot.slane %v2993_v1, 1  ;;  %v279_v51 = vrot.slane %v2996_v41, 1  ;;  %v317_v55 = vrot.slane %v186_v43, 1 }
  0x6e   : > { %2097 = vrot.lane.b32.xlu0 %v2865_v59, %s2643_s29  ;;  %v319_v56 = vrot.slane %v187_v46, 1 }
  0x6f   : > { %v280_v58 = vsel %vm245_vm0, %v277_v49, %v279_v51 }
  0x70   : > { %2112 = vrot.lane.b32.xlu1 %v2071_v15, %s2644_s30  ;;  %v320_v61 = vsel %vm245_vm0, %v317_v55, %v319_v56 }
  0x72   : > { %2107 = vrot.lane.b32.xlu0 %v2061_v9, %s2644_s30 }
  0x74   : > { %2122 = vrot.lane.b32.xlu1 %v2121_v32, %s2645_s3 }
  0x76   : > { %2117 = vrot.lane.b32.xlu0 %v2116_v35, %s2645_s3 }
  0x78   : > { %2132 = vrot.lane.b32.xlu1 %v2901_v39, %s2646_s4 }
  0x7a   : > { %2127 = vrot.lane.b32.xlu0 %v2904_v40, %s2646_s4 }
  0x7c   : > { %2142 = vrot.lane.b32.xlu1 %v2865_v59, %s2640_s26  ;;  %v271_v59 = vrot.slane %v158_v53, 1 }
  0x7e   : > { %2137 = vrot.lane.b32.xlu0 %v2912_v48, %s2647_s5  ;;  %v273_v8 = vsel %vm245_vm0, %v271_v59, %v272_v60  ;;  %v318_v60 = vsel %vm245_vm0, %v316_v54, %v317_v55 }
  0x7f   : > { %v2957_v23 = vpack.i.bf16 %v275_v20, %v273_v8  ;;  %v398_v8 = vrot.slane %v186_v43, 2  ;;  %v400_v20 = vrot.slane %v187_v46, 2 }
  0x80   : > { %2152 = vrot.lane.b32.xlu1 %v2056_v14, %s2640_s26  ;;  %v393_v14 = vrot.slane %v183_v57, 2 }
  0x82   : > { %2147 = vrot.lane.b32.xlu0 %v2920_v52, %s2647_s5  ;;  %v394_v26 = vsel %vm326_vm1, %v392_v13, %v393_v14  ;;  %v396_v27 = vsel %vm326_vm1, %v393_v14, %v395_v21 }
  0x83   : > { %v2975_v33 = vpack.i.bf16 %v396_v27, %v394_v26 }
  0x84   : > { %2162 = vrot.lane.b32.xlu1 %v2071_v15, %s2641_s27  ;;  %v313_v15 = vsel %vm245_vm0, %v311_v62, %v312_v63  ;;  %v3026_v62 = vpack.i.bf16 %v2993_v1, %v2990_v0  ;;  %v3028_v63 = vpack.i.bf16 %v186_v43, %v185_v42 }
  0x85   : > { %v2963_v25 = vpack.i.bf16 %v315_v17, %v313_v15  ;;  %v3038_v15 = vpack.i.bf16 %v320_v61, %v318_v60  ;;  %v357_v17 = vrot.slane %v2990_v0, 2 }
  0x86   : > { %2157 = vrot.lane.b32.xlu0 %v2061_v9, %s2641_s27 }
  0x88   : > { %2172 = vrot.lane.b32.xlu1 %v2121_v32, %s2642_s28 }
  0x8a   : > { %2167 = vrot.lane.b32.xlu0 %v2116_v35, %s2642_s28  ;;  %v356_v35 = vsel %vm326_vm1, %v353_v29, %v355_v30  ;;  %v358_v30 = vrot.slane %v2993_v1, 2 }
  0x8b   : > { %v2987_v38 = vpack.i.bf16 %v356_v35, %v354_v34  ;;  %v360_v34 = vrot.slane %v2996_v41, 2  ;;  %v3173_v41 = vld [vmem:[%s2717_s25 + $0x168] sm:$0xff] }
  0x8c   : > { %2182 = vrot.lane.b32.xlu1 %v2901_v39, %s2643_s29 }
  0x8e   : > { %2177 = vrot.lane.b32.xlu0 %v2904_v40, %s2643_s29 }
  0x90   : > { %2192 = vrot.lane.b32.xlu1 %v2920_v52, %s2644_s30 }
  0x92   : > { %2187 = vrot.lane.b32.xlu0 %v2912_v48, %s2644_s30  ;;  %v2947_v9 = vpop.permute.xlu1 %1917 }
  0x94   : > { %v2953_v22 = vpop.permute.xlu0 %1907  ;;  %2202 = vrot.lane.b32.xlu1 %v2941_v4, %s2645_s3 }
  0x95   : > { %v1910_v13 = vunpack.i.h.bf16 %v2953_v22  ;;  %v1909_v14 = vunpack.i.l.bf16 %v2953_v22 }
  0x96   : > { %2197 = vrot.lane.b32.xlu0 %v2949_v10, %s2645_s3  ;;  %v2961_v24 = vpop.permute.xlu1 %1922 }
  0x97   : > { %v1925_v21 = vunpack.i.h.bf16 %v2961_v24  ;;  %v1924_v26 = vunpack.i.l.bf16 %v2961_v24  ;;  %v1202_v43 = vsel %vm1201_vm2, %v2732_v6, %v1909_v14 }
  0x98   : > { %v2967_v31 = vpop.permute.xlu0 %1912  ;;  %2212 = vrot.lane.b32.xlu1 %v2957_v23, %s2646_s4 }
  0x9a   : > { %2207 = vrot.lane.b32.xlu0 %v2963_v25, %s2646_s4  ;;  %v2973_v32 = vpop.permute.xlu1 %1937 }
  0x9b   : > { %v1939_v27 = vunpack.i.l.bf16 %v2973_v32 }
  0x9c   : > { %v2979_v2 = vpop.permute.xlu0 %1927  ;;  %2222 = vrot.lane.b32.xlu1 %v2904_v40, %s2640_s26  ;;  %v276_v40 = vrot.slane %v2990_v0, 1 }
  0x9d   : > { %v1930_v22 = vunpack.i.h.bf16 %v2979_v2  ;;  %v1929_v29 = vunpack.i.l.bf16 %v2979_v2  ;;  %v3061_v2 = vsel %vm326_vm1, %v398_v8, %v400_v20  ;;  %v1235_v51 = vsel %vm1234_vm3, %v1202_v43, %v1939_v27 }
  0x9e   : > { %2217 = vrot.lane.b32.xlu0 %v2975_v33, %s2647_s5  ;;  %v2985_v36 = vpop.permute.xlu1 %1942 }
  0x9f   : > { %v1945_v24 = vunpack.i.h.bf16 %v2985_v36  ;;  %v1944_v35 = vunpack.i.l.bf16 %v2985_v36 }
  0xa0   : > { %v3001_v47 = vpop.permute.xlu0 %1932  ;;  %2232 = vrot.lane.b32.xlu1 %v2901_v39, %s2640_s26  ;;  %v278_v39 = vsel %vm245_vm0, %v276_v40, %v277_v49  ;;  %v1219_v40 = vsel %vm1201_vm2, %v2744_v12, %v1925_v21  ;;  %v1218_v49 = vsel %vm1201_vm2, %v2741_v11, %v1924_v26 }
  0xa1   : > { %v3034_v3 = vpack.i.bf16 %v280_v58, %v278_v39  ;;  %v1935_v36 = vunpack.i.h.bf16 %v3001_v47  ;;  %v1934_v46 = vunpack.i.l.bf16 %v3001_v47  ;;  %v1252_v6 = vsel %vm1234_vm3, %v1219_v40, %v1930_v22 }
  0xa2   : > { %2227 = vrot.lane.b32.xlu0 %v2987_v38, %s2647_s5  ;;  %v3010_v53 = vpop.permute.xlu1 %1952  ;;  %v1251_v55 = vsel %vm1234_vm3, %v1218_v49, %v1929_v29  ;;  %v1268_v12 = vsel %vm1267_vm4, %v1235_v51, %v1944_v35 }
  0xa3   : > { %v1284_v61 = vsel %vm1267_vm4, %v1251_v55, %v1934_v46 }
  0xa4   : > { %v3012_v57 = vpop.permute.xlu0 %1947  ;;  %2242 = vrot.lane.b32.xlu1 %v2920_v52, %s2641_s27 }
  0xa5   : > { %v1950_v47 = vunpack.i.h.bf16 %v3012_v57  ;;  %v1949_v56 = vunpack.i.l.bf16 %v3012_v57  ;;  %v1955_v57 = vunpack.i.h.bf16 %v3010_v53 }
  0xa6   : > { %2237 = vrot.lane.b32.xlu0 %v2912_v48, %s2641_s27  ;;  %v3020_v59 = vpop.permute.xlu1 %1962  ;;  %v397_v48 = vrot.slane %v185_v42, 2  ;;  %v1203_v42 = vsel %vm1201_vm2, %v2735_v7, %v1910_v13  ;;  %v1954_v13 = vunpack.i.l.bf16 %v3010_v53 }
  0xa7   : > { %v1317_v26 = vsel %vm1300_vm5, %v1284_v61, %v1949_v56  ;;  %v1965_v27 = vunpack.i.h.bf16 %v3020_v59  ;;  %v1964_v22 = vunpack.i.l.bf16 %v3020_v59 }
  0xa8   : > { %v3030_v52 = vpop.permute.xlu0 %1957  ;;  %2252 = vrot.lane.b32.xlu1 %v2941_v4, %s2642_s28  ;;  %v1940_v4 = vunpack.i.h.bf16 %v2973_v32 }
  0xa9   : > { %v1960_v39 = vunpack.i.h.bf16 %v3030_v52  ;;  %v1959_v58 = vunpack.i.l.bf16 %v3030_v52 }
  0xaa   : > { %2247 = vrot.lane.b32.xlu0 %v2949_v10, %s2642_s28  ;;  %v3047_v28 = vpop.permute.xlu1 %1972  ;;  %v3058_v10 = vsel %vm326_vm1, %v397_v48, %v398_v8  ;;  %v1236_v54 = vsel %vm1234_vm3, %v1203_v42, %v1940_v4  ;;  %v1285_v48 = vsel %vm1267_vm4, %v1252_v6, %v1935_v36 }
  0xab   : > { %v1269_v11 = vsel %vm1267_vm4, %v1236_v54, %v1945_v24  ;;  %v1318_v4 = vsel %vm1300_vm5, %v1285_v48, %v1950_v47  ;;  %v1350_v29 = vsel %vm1333_vm6, %v1317_v26, %v1959_v58  ;;  %v1975_v53 = vunpack.i.h.bf16 %v3047_v28 }
  0xac   : > { %v1968_v32 = vpop.permute.xlu0 %1967  ;;  %2262 = vrot.lane.b32.xlu1 %v2957_v23, %s2643_s29  ;;  %v1351_v24 = vsel %vm1333_vm6, %v1318_v4, %v1960_v39  ;;  %v1974_v35 = vunpack.i.l.bf16 %v3047_v28  ;;  %v1301_v54 = vsel %vm1300_vm5, %v1268_v12, %v1954_v13  ;;  %v1302_v6 = vsel %vm1300_vm5, %v1269_v11, %v1955_v57 }
  0xad   : > { %v1970_v8 = vunpack.i.h.bf16 %v1968_v32  ;;  %v1969_v20 = vunpack.i.l.bf16 %v1968_v32  ;;  %v1334_v56 = vsel %vm1333_vm6, %v1301_v54, %v1964_v22  ;;  %v1335_v39 = vsel %vm1333_vm6, %v1302_v6, %v1965_v27  ;;  %v3158_v27 = vld [vmem:[%s2717_s25 + $0xa8] sm:$0xff]  ;;  %v3161_v22 = vld [vmem:[%s2717_s25 + $0xb0] sm:$0xff] }
  0xae   : > { %2257 = vrot.lane.b32.xlu0 %v2963_v25, %s2643_s29  ;;  %v1983_v7 = vpop.permute.xlu1 %1982  ;;  %v1367_v11 = vsel %vm1366_vm7, %v1334_v56, %v1974_v35  ;;  %v359_v26 = vsel %vm326_vm1, %v357_v17, %v358_v30  ;;  %v3176_v17 = vld [vmem:[%s2717_s25 + $0x170] sm:$0xff]  ;;  %v321_v35 = vrot.slane %v3173_v41, 1 }
  0xaf   : > { %v1383_v36 = vsel %vm1366_vm7, %v1350_v29, %v1969_v20  ;;  %v1384_v46 = vsel %vm1366_vm7, %v1351_v24, %v1970_v8  ;;  %v1985_v40 = vunpack.i.h.bf16 %v1983_v7  ;;  %v1984_v59 = vunpack.i.l.bf16 %v1983_v7  ;;  %v3164_v29 = vld [vmem:[%s2717_s25 + $0xb8] sm:$0x3] }
  0xb0   : > { %v1978_v60 = vpop.permute.xlu0 %1977  ;;  %2272 = vrot.lane.b32.xlu1 %v2987_v38, %s2644_s30  ;;  %v3137_v20 = vpack.i.bf16 %v3061_v2, %v3058_v10  ;;  %v361_v10 = vsel %vm326_vm1, %v358_v30, %v360_v34  ;;  %v281_v30 = vrot.slane %v3158_v27, 1  ;;  %v282_v34 = vrot.slane %v3161_v22, 1 }
  0xb1   : > { %v1980_v14 = vunpack.i.h.bf16 %v1978_v60  ;;  %v1979_v21 = vunpack.i.l.bf16 %v1978_v60  ;;  %v1368_v60 = vsel %vm1366_vm7, %v1335_v39, %v1975_v53  ;;  %v1400_v57 = vsel %vm1399_vm8, %v1367_v11, %v1984_v59 }
  0xb2   : > { %2267 = vrot.lane.b32.xlu0 %v2975_v33, %s2644_s30  ;;  %v3093_v52 = vpop.permute.xlu1 %1992  ;;  %v1401_v13 = vsel %vm1399_vm8, %v1368_v60, %v1985_v40  ;;  %v3170_v1 = vpack.i.bf16 %v361_v10, %v359_v26  ;;  %v284_v24 = vrot.slane %v3164_v29, 1  ;;  %v3195_v40 = vpack.i.bf16 %v3161_v22, %v3158_v27 }
  0xb3   : > { %v1416_v51 = vsel %vm1399_vm8, %v1383_v36, %v1979_v21  ;;  %v1417_v28 = vsel %vm1399_vm8, %v1384_v46, %v1980_v14  ;;  %v1994_v36 = vunpack.i.l.bf16 %v3093_v52  ;;  %v3202_v59 = vsel %vm245_vm0, %v281_v30, %v282_v34 }
  0xb4   : > { %v1988_v32 = vpop.permute.xlu0 %1987  ;;  %2282 = vrot.lane.b32.xlu1 %v3026_v62, %s2645_s3  ;;  %v402_v39 = vrot.slane %v3173_v41, 2 }
  0xb5   : > { %v1990_v42 = vunpack.i.h.bf16 %v1988_v32  ;;  %v1989_v43 = vunpack.i.l.bf16 %v1988_v32  ;;  %v322_v32 = vrot.slane %v3176_v17, 1 }
  0xb6   : > { %2277 = vrot.lane.b32.xlu0 %v3028_v63, %s2645_s3  ;;  %v3109_v49 = vpop.permute.xlu1 %2002 }
  0xb7   : > { %v1449_v55 = vsel %vm1432_vm9, %v1416_v51, %v1989_v43  ;;  %v1450_v47 = vsel %vm1432_vm9, %v1417_v28, %v1990_v42  ;;  %v1995_v43 = vunpack.i.h.bf16 %v3093_v52  ;;  %v3205_v51 = vsel %vm245_vm0, %v282_v34, %v284_v24 }
  0xb8   : > { %v1998_v58 = vpop.permute.xlu0 %1997  ;;  %2292 = vrot.lane.b32.xlu1 %v3034_v3, %s2646_s4  ;;  %v1810_v12 = vpack.c.bf16 %v1450_v47, %v1449_v55  ;;  %v1915_v52 = vunpack.i.h.bf16 %v2967_v31  ;;  %v1914_v28 = vunpack.i.l.bf16 %v2967_v31  ;;  %v2005_v54 = vunpack.i.h.bf16 %v3109_v49 }
  0xb9   : > { %v2000_v61 = vunpack.i.h.bf16 %v1998_v58  ;;  %v1999_v48 = vunpack.i.l.bf16 %v1998_v58  ;;  %v2004_v6 = vunpack.i.l.bf16 %v3109_v49  ;;  %v3214_v47 = vsel %vm245_vm0, %v321_v35, %v322_v32 }
  0xba   : > { %2287 = vrot.lane.b32.xlu0 %v3038_v15, %s2646_s4  ;;  %1812 = vmatprep.subr.msk.bf16.mxu0 %vm3119_vm11, %v1810_v12  ;;  %v3133_v8 = vpop.permute.xlu1 %2012  ;;  %v403_v58 = vrot.slane %v3176_v17, 2  ;;  %v1221_v31 = vsel %vm1201_vm2, %v2783_v45, %v1995_v43  ;;  %v1220_v49 = vsel %vm1201_vm2, %v2780_v44, %v1994_v36  ;;  %v1205_v45 = vsel %vm1201_vm2, %v2753_v19, %v1915_v52 }
  0xbb   : > { %v1433_v14 = vsel %vm1432_vm9, %v1400_v57, %v1999_v48  ;;  %v1434_v21 = vsel %vm1432_vm9, %v1401_v13, %v2000_v61  ;;  %v2015_v12 = vunpack.i.h.bf16 %v3133_v8  ;;  %v1204_v44 = vsel %vm1201_vm2, %v2750_v18, %v1914_v28 }
  0xbc   : > { %v3153_v2 = vpop.permute.xlu0 %2007  ;;  %2302 = vrot.lane.b32.xlu1 %v2963_v25, %s2640_s26  ;;  %v1813_v4 = vpack.c.bf16 %v1434_v21, %v1433_v14  ;;  %v3179_v25 = vld [vmem:[%s2717_s25 + $0x178] sm:$0x3]  ;;  %v1253_v13 = vsel %vm1234_vm3, %v1220_v49, %v2004_v6 }
  0xbd   : > { %v324_v42 = vrot.slane %v3179_v25, 1  ;;  %v2010_v60 = vunpack.i.h.bf16 %v3153_v2  ;;  %v2009_v61 = vunpack.i.l.bf16 %v3153_v2 }
  0xbe   : > { %2297 = vrot.lane.b32.xlu0 %v3137_v20, %s2647_s5  ;;  %1815 = vmatpush3.bf16.xpose.msk.msra.mxu0 %vm3119_vm11, %v1813_v4  ;;  %v2023_v0 = vpop.permute.xlu1 %2022 }
  0xbf   : > { %v3217_v56 = vsel %vm245_vm0, %v322_v32, %v324_v42  ;;  %v2025_v48 = vunpack.i.h.bf16 %v2023_v0  ;;  %v2024_v57 = vunpack.i.l.bf16 %v2023_v0  ;;  %v1237_v30 = vsel %vm1234_vm3, %v1204_v44, %v2009_v61 }
  0xc0   : > { %v2018_v53 = vpop.permute.xlu0 %2017  ;;  %2312 = vrot.lane.b32.xlu1 %v2957_v23, %s2640_s26  ;;  %v3199_v23 = vpack.i.bf16 %v3176_v17, %v3173_v41  ;;  %v1238_v34 = vsel %vm1234_vm3, %v1205_v45, %v2010_v60 }
  0xc1   : > { %v2019_v21 = vunpack.i.l.bf16 %v2018_v53 }
  0xc2   : > { %2307 = vrot.lane.b32.xlu0 %v3170_v1, %s2647_s5  ;;  %v2033_v46 = vpop.permute.xlu1 %2032 }
  0xc3   : > { %v2035_v26 = vunpack.i.h.bf16 %v2033_v46  ;;  %v2034_v10 = vunpack.i.l.bf16 %v2033_v46  ;;  %v1270_v36 = vsel %vm1267_vm4, %v1237_v30, %v2019_v21 }
  0xc4   : > { %v2028_v55 = vpop.permute.xlu0 %2027  ;;  %2322 = vrot.lane.b32.xlu1 %v2987_v38, %s2641_s27  ;;  %v2014_v38 = vunpack.i.l.bf16 %v3133_v8  ;;  %v1254_v8 = vsel %vm1234_vm3, %v1221_v31, %v2005_v54 }
  0xc5   : > { %v1287_v4 = vsel %vm1267_vm4, %v1254_v8, %v2015_v12  ;;  %v2029_v35 = vunpack.i.l.bf16 %v2028_v55 }
  0xc6   : > { %2317 = vrot.lane.b32.xlu0 %v2975_v33, %s2641_s27  ;;  %v2043_v11 = vpop.permute.xlu1 %2042  ;;  %v2020_v33 = vunpack.i.h.bf16 %v2018_v53  ;;  %v1286_v2 = vsel %vm1267_vm4, %v1253_v13, %v2014_v38  ;;  %v1320_v24 = vsel %vm1300_vm5, %v1287_v4, %v2025_v48  ;;  %v2030_v53 = vunpack.i.h.bf16 %v2028_v55 }
  0xc7   : > { %v2045_v19 = vunpack.i.h.bf16 %v2043_v11  ;;  %v2044_v0 = vunpack.i.l.bf16 %v2043_v11  ;;  %v1353_v52 = vsel %vm1333_vm6, %v1320_v24, %v2035_v26  ;;  %v1303_v60 = vsel %vm1300_vm5, %v1270_v36, %v2029_v35 }
  0xc8   : > { %v2038_v14 = vpop.permute.xlu0 %2037  ;;  %2332 = vrot.lane.b32.xlu1 %v3026_v62, %s2642_s28  ;;  %v1319_v62 = vsel %vm1300_vm5, %v1286_v2, %v2024_v57  ;;  %v405_v2 = vrot.slane %v3179_v25, 2  ;;  %v3282_v25 = vpack.i.bf16 %v3205_v51, %v3202_v59  ;;  %v404_v59 = vsel %vm326_vm1, %v402_v39, %v403_v58 }
  0xc9   : > { %v1352_v46 = vsel %vm1333_vm6, %v1319_v62, %v2034_v10  ;;  %v1386_v54 = vsel %vm1366_vm7, %v1353_v52, %v2045_v19  ;;  %v2040_v6 = vunpack.i.h.bf16 %v2038_v14  ;;  %v2039_v55 = vunpack.i.l.bf16 %v2038_v14 }
  0xca   : > { %2327 = vrot.lane.b32.xlu0 %v3028_v63, %s2642_s28  ;;  %v2053_v18 = vpop.permute.xlu1 %2052  ;;  %v1271_v63 = vsel %vm1267_vm4, %v1238_v34, %v2020_v33  ;;  %v1385_v28 = vsel %vm1366_vm7, %v1352_v46, %v2044_v0  ;;  %v406_v51 = vsel %vm326_vm1, %v403_v58, %v405_v2  ;;  %v363_v36 = vrot.slane %v3161_v22, 2  ;;  %v3330_v58 = vld [vmem:[%s2717_s25 + $0x180] sm:$0xff]  ;;  %v3333_v46 = vld [vmem:[%s2717_s25 + $0x188] sm:$0xff]  ;;  %v2550_v2 = vld [vmem:[%s2717_s25 + $0x38] sm:$0xff] }
  0xcb   : > { %v2055_v32 = vunpack.i.h.bf16 %v2053_v18  ;;  %v2054_v42 = vunpack.i.l.bf16 %v2053_v18  ;;  %v1304_v61 = vsel %vm1300_vm5, %v1271_v63, %v2030_v53  ;;  %v1336_v33 = vsel %vm1333_vm6, %v1303_v60, %v2039_v55 }
  0xcc   : > { %v2048_v43 = vpop.permute.xlu0 %2047  ;;  %2342 = vrot.lane.b32.xlu1 %v3034_v3, %s2643_s29  ;;  %v1337_v21 = vsel %vm1333_vm6, %v1304_v61, %v2040_v6  ;;  %v365_v63 = vrot.slane %v3164_v29, 2  ;;  %v3361_v60 = vpack.i.bf16 %v3333_v46, %v3330_v58 }
  0xcd   : > { %v2050_v49 = vunpack.i.h.bf16 %v2048_v43  ;;  %v2049_v12 = vunpack.i.l.bf16 %v2048_v43  ;;  %v1418_v48 = vsel %vm1399_vm8, %v1385_v28, %v2054_v42  ;;  %v1419_v57 = vsel %vm1399_vm8, %v1386_v54, %v2055_v32  ;;  %v3340_v28 = vld [vmem:[%s2717_s25 + $0x190] sm:$0x3] }
  0xce   : > { %2337 = vrot.lane.b32.xlu0 %v3038_v15, %s2643_s29  ;;  %v2063_v31 = vpop.permute.xlu1 %2062  ;;  %v3292_v42 = vpack.i.bf16 %v3217_v56, %v3214_v47  ;;  %v362_v43 = vrot.slane %v3158_v27, 2  ;;  %v3315_v27 = vpack.i.bf16 %v406_v51, %v404_v59  ;;  %v366_v29 = vsel %vm326_vm1, %v363_v36, %v365_v63 }
  0xcf   : > { %v2065_v38 = vunpack.i.h.bf16 %v2063_v31  ;;  %v2064_v11 = vunpack.i.l.bf16 %v2063_v31  ;;  %v1369_v4 = vsel %vm1366_vm7, %v1336_v33, %v2049_v12  ;;  %v1370_v19 = vsel %vm1366_vm7, %v1337_v21, %v2050_v49  ;;  %v2548_v49 = vld [vmem:[%s2717_s25 + $0xc0] sm:$0xff] }
  0xd0   : > { %v2058_v45 = vpop.permute.xlu0 %2057  ;;  %2352 = vrot.lane.b32.xlu1 %v3170_v1, %s2644_s30  ;;  %v364_v22 = vsel %vm326_vm1, %v362_v43, %v363_v36  ;;  %v411_v54 = vrot.slane %v3333_v46, 1  ;;  %v413_v55 = vrot.slane %v3340_v28, 1 }
  0xd1   : > { %v1451_v44 = vsel %vm1432_vm9, %v1418_v48, %v2064_v11  ;;  %v1452_v13 = vsel %vm1432_vm9, %v1419_v57, %v2065_v38  ;;  %v2060_v8 = vunpack.i.h.bf16 %v2058_v45  ;;  %v2059_v14 = vunpack.i.l.bf16 %v2058_v45 }
  0xd2   : > { %2347 = vrot.lane.b32.xlu0 %v3137_v20, %s2644_s30  ;;  %v2073_v26 = vpop.permute.xlu1 %2072  ;;  %v1816_v10 = vpack.c.bf16 %v1452_v13, %v1451_v44  ;;  %v3327_v39 = vpack.i.bf16 %v366_v29, %v364_v22  ;;  %v1920_v38 = vunpack.i.h.bf16 %v2947_v9  ;;  %v1919_v11 = vunpack.i.l.bf16 %v2947_v9 }
  0xd3   : > { %v2075_v0 = vunpack.i.h.bf16 %v2073_v26  ;;  %v2074_v18 = vunpack.i.l.bf16 %v2073_v26  ;;  %v1402_v30 = vsel %vm1399_vm8, %v1369_v4, %v2059_v14  ;;  %v1403_v34 = vsel %vm1399_vm8, %v1370_v19, %v2060_v8  ;;  %v2551_v19 = vld [vmem:[%s2717_s25 + $0x30] sm:$0xff] }
  0xd4   : > { %v3274_v62 = vpop.permute.xlu0 %2067  ;;  %2362 = vrot.lane.b32.xlu1 %v3195_v40, %s2645_s3  ;;  %1818 = vmatprep.subr.msk.bf16.mxu0 %vm3119_vm11, %v1816_v10  ;;  %v3377_v8 = vsel %vm245_vm0, %v411_v54, %v413_v55  ;;  %v415_v14 = vrot.slane %v3330_v58, 2  ;;  %v418_v10 = vrot.slane %v3340_v28, 2  ;;  %v1207_v4 = vsel %vm1201_vm2, %v2550_v2, %v1920_v38 }
  0xd5   : > { %v1435_v24 = vsel %vm1432_vm9, %v1402_v30, %v2074_v18  ;;  %v1436_v53 = vsel %vm1432_vm9, %v1403_v34, %v2075_v0  ;;  %v2070_v48 = vunpack.i.h.bf16 %v3274_v62  ;;  %v1206_v0 = vsel %vm1201_vm2, %v2551_v19, %v1919_v11  ;;  %v2552_v34 = vld [vmem:[%s2717_s25 + $0xf8] sm:$0xff] }
  0xd6   : > { %v1819_v35 = vpack.c.bf16 %v1436_v53, %v1435_v24  ;;  %2357 = vrot.lane.b32.xlu0 %v3199_v23, %s2645_s3  ;;  %v3288_v32 = vpop.permute.xlu1 %2082  ;;  %v2553_v24 = vld [vmem:[%s2717_s25 + $0xf0] sm:$0xff] }
  0xd7   : > { %v2085_v57 = vunpack.i.h.bf16 %v3288_v32  ;;  %v2084_v45 = vunpack.i.l.bf16 %v3288_v32 }
  0xd8   : > { %v3305_v47 = vpop.permute.xlu0 %2077  ;;  %2372 = vrot.lane.b32.xlu1 %v3282_v25, %s2646_s4  ;;  %1821 = vmatpush3.bf16.xpose.msk.msra.mxu0 %vm3119_vm11, %v1819_v35 }
  0xd9   : > { %v2080_v44 = vunpack.i.h.bf16 %v3305_v47  ;;  %v2079_v13 = vunpack.i.l.bf16 %v3305_v47  ;;  %v1240_v53 = vsel %vm1234_vm3, %v1207_v4, %v2085_v57  ;;  %v1239_v35 = vsel %vm1234_vm3, %v1206_v0, %v2084_v45 }
  0xda   : > { %2367 = vrot.lane.b32.xlu0 %v3292_v42, %s2646_s4  ;;  %v3313_v41 = vpop.permute.xlu1 %2092 }
  0xdb   : > { %v2095_v33 = vunpack.i.h.bf16 %v3313_v41  ;;  %v2094_v21 = vunpack.i.l.bf16 %v3313_v41 }
  0xdc   : > { %v3319_v17 = vpop.permute.xlu0 %2087  ;;  %2382 = vrot.lane.b32.xlu1 %v3038_v15, %s2640_s26  ;;  %v410_v15 = vrot.slane %v3330_v58, 1 }
  0xdd   : > { %v2090_v18 = vunpack.i.h.bf16 %v3319_v17  ;;  %v2089_v30 = vunpack.i.l.bf16 %v3319_v17  ;;  %v1272_v63 = vsel %vm1267_vm4, %v1239_v35, %v2094_v21  ;;  %v1273_v47 = vsel %vm1267_vm4, %v1240_v53, %v2095_v33 }
  0xde   : > { %2377 = vrot.lane.b32.xlu0 %v3315_v27, %s2647_s5  ;;  %v3325_v56 = vpop.permute.xlu1 %2102  ;;  %v3364_v61 = vsel %vm245_vm0, %v410_v15, %v411_v54 }
  0xdf   : > { %v2104_v55 = vunpack.i.l.bf16 %v3325_v56 }
  0xe0   : > { %v3335_v52 = vpop.permute.xlu0 %2097  ;;  %2392 = vrot.lane.b32.xlu1 %v3034_v3, %s2640_s26  ;;  %v2549_v3 = vld [vmem:[%s2717_s25 + $0xc8] sm:$0xff] }
  0xe1   : > { %v3355_v12 = vpack.i.bf16 %v2549_v3, %v2548_v49  ;;  %v2100_v43 = vunpack.i.h.bf16 %v3335_v52  ;;  %v2099_v36 = vunpack.i.l.bf16 %v3335_v52  ;;  %v2105_v52 = vunpack.i.h.bf16 %v3325_v56 }
  0xe2   : > { %2387 = vrot.lane.b32.xlu0 %v3327_v39, %s2647_s5  ;;  %v3346_v6 = vpop.permute.xlu1 %2112 }
  0xe4   : > { %v3349_v31 = vpop.permute.xlu0 %2107  ;;  %2402 = vrot.lane.b32.xlu1 %v3170_v1, %s2641_s27  ;;  %v2069_v1 = vunpack.i.l.bf16 %v3274_v62  ;;  %v1223_v62 = vsel %vm1201_vm2, %v2552_v34, %v2070_v48  ;;  %v2115_v48 = vunpack.i.h.bf16 %v3346_v6 }
  0xe5   : > { %v1256_v51 = vsel %vm1234_vm3, %v1223_v62, %v2080_v44  ;;  %v2110_v41 = vunpack.i.h.bf16 %v3349_v31  ;;  %v2109_v22 = vunpack.i.l.bf16 %v3349_v31 }
  0xe6   : > { %2397 = vrot.lane.b32.xlu0 %v3137_v20, %s2641_s27  ;;  %v3372_v9 = vpop.permute.xlu1 %2122  ;;  %v416_v20 = vrot.slane %v3333_v46, 2  ;;  %v1289_v17 = vsel %vm1267_vm4, %v1256_v51, %v2090_v18  ;;  %v1305_v18 = vsel %vm1300_vm5, %v1272_v63, %v2104_v55 }
  0xe7   : > { %v1322_v11 = vsel %vm1300_vm5, %v1289_v17, %v2100_v43  ;;  %v2125_v56 = vunpack.i.h.bf16 %v3372_v9  ;;  %v2124_v44 = vunpack.i.l.bf16 %v3372_v9 }
  0xe8   : > { %v2118_v26 = vpop.permute.xlu0 %2117  ;;  %2412 = vrot.lane.b32.xlu1 %v3195_v40, %s2642_s28  ;;  %v1222_v40 = vsel %vm1201_vm2, %v2553_v24, %v2069_v1  ;;  %v2114_v1 = vunpack.i.l.bf16 %v3346_v6  ;;  %v1355_v45 = vsel %vm1333_vm6, %v1322_v11, %v2110_v41  ;;  %v3456_v41 = vpack.i.bf16 %v3377_v8, %v3364_v61 }
  0xe9   : > { %v1255_v59 = vsel %vm1234_vm3, %v1222_v40, %v2079_v13  ;;  %v2120_v15 = vunpack.i.h.bf16 %v2118_v26  ;;  %v2119_v54 = vunpack.i.l.bf16 %v2118_v26  ;;  %v419_v17 = vsel %vm326_vm1, %v416_v20, %v418_v10  ;;  %v3491_v10 = vld [vmem:[%s2717_s25 + $0x198] sm:$0xff] }
  0xea   : > { %2407 = vrot.lane.b32.xlu0 %v3199_v23, %s2642_s28  ;;  %v2133_v32 = vpop.permute.xlu1 %2132  ;;  %v1288_v23 = vsel %vm1267_vm4, %v1255_v59, %v2089_v30  ;;  %v1306_v30 = vsel %vm1300_vm5, %v1273_v47, %v2105_v52  ;;  %v1338_v24 = vsel %vm1333_vm6, %v1305_v18, %v2114_v1  ;;  %v423_v55 = vrot.slane %v3491_v10, 1 }
  0xeb   : > { %v1321_v38 = vsel %vm1300_vm5, %v1288_v23, %v2099_v36  ;;  %v1388_v21 = vsel %vm1366_vm7, %v1355_v45, %v2120_v15  ;;  %v2135_v4 = vunpack.i.h.bf16 %v2133_v32  ;;  %v2134_v6 = vunpack.i.l.bf16 %v2133_v32  ;;  %v3494_v15 = vld [vmem:[%s2717_s25 + $0x1a0] sm:$0xff] }
  0xec   : > { %v2128_v29 = vpop.permute.xlu0 %2127  ;;  %2422 = vrot.lane.b32.xlu1 %v3282_v25, %s2643_s29  ;;  %v1354_v57 = vsel %vm1333_vm6, %v1321_v38, %v2109_v22  ;;  %v1339_v40 = vsel %vm1333_vm6, %v1306_v30, %v2115_v48  ;;  %v1371_v32 = vsel %vm1366_vm7, %v1338_v24, %v2124_v44  ;;  %v417_v23 = vsel %vm326_vm1, %v415_v14, %v416_v20  ;;  %v2557_v30 = vld [vmem:[%s2717_s25 + $0x48] sm:$0xff] }
  0xed   : > { %v2130_v49 = vunpack.i.h.bf16 %v2128_v29  ;;  %v2129_v3 = vunpack.i.l.bf16 %v2128_v29  ;;  %v1387_v33 = vsel %vm1366_vm7, %v1354_v57, %v2119_v54  ;;  %v1372_v59 = vsel %vm1366_vm7, %v1339_v40, %v2125_v56  ;;  %v3497_v54 = vld [vmem:[%s2717_s25 + $0x1a8] sm:$0x3]  ;;  %v2558_v40 = vld [vmem:[%s2717_s25 + $0x110] sm:$0xff] }
  0xee   : > { %2417 = vrot.lane.b32.xlu0 %v3292_v42, %s2643_s29  ;;  %v3416_v31 = vpop.permute.xlu1 %2142  ;;  %v1404_v36 = vsel %vm1399_vm8, %v1371_v32, %v2134_v6  ;;  %v1405_v63 = vsel %vm1399_vm8, %v1372_v59, %v2135_v4  ;;  %v3476_v14 = vpack.i.bf16 %v419_v17, %v417_v23  ;;  %v424_v52 = vrot.slane %v3494_v15, 1 }
  0xef   : > { %v1420_v19 = vsel %vm1399_vm8, %v1387_v33, %v2129_v3  ;;  %v1421_v0 = vsel %vm1399_vm8, %v1388_v21, %v2130_v49  ;;  %v3513_v3 = vld [vmem:[%s2717_s25 + $0xe0] sm:$0xff]  ;;  %v426_v11 = vrot.slane %v3497_v54, 1  ;;  %v429_v57 = vrot.slane %v3494_v15, 2 }
  0xf0   : > { %v2138_v13 = vpop.permute.xlu0 %2137  ;;  %2432 = vrot.lane.b32.xlu1 %v3327_v39, %s2644_s30  ;;  %v2516_v45 = vpack.i.bf16 %v3494_v15, %v3491_v10  ;;  %v2144_v56 = vunpack.i.l.bf16 %v3416_v31  ;;  %v3533_v4 = vsel %vm245_vm0, %v423_v55, %v424_v52 }
  0xf1   : > { %v2140_v26 = vunpack.i.h.bf16 %v2138_v13  ;;  %v2139_v2 = vunpack.i.l.bf16 %v2138_v13 }
  0xf2   : > { %2427 = vrot.lane.b32.xlu0 %v3315_v27, %s2644_s30  ;;  %v3434_v9 = vpop.permute.xlu1 %2152 }
  0xf3   : > { %v1453_v34 = vsel %vm1432_vm9, %v1420_v19, %v2139_v2  ;;  %v1454_v62 = vsel %vm1432_vm9, %v1421_v0, %v2140_v26  ;;  %v2155_v48 = vunpack.i.h.bf16 %v3434_v9  ;;  %v2154_v1 = vunpack.i.l.bf16 %v3434_v9  ;;  %v2556_v9 = vld [vmem:[%s2717_s25 + $0x50] sm:$0xff] }
  0xf4   : > { %v1822_v53 = vpack.c.bf16 %v1454_v62, %v1453_v34  ;;  %v2148_v35 = vpop.permute.xlu0 %2147  ;;  %2442 = vrot.lane.b32.xlu1 %v3355_v12, %s2645_s3  ;;  %v428_v2 = vrot.slane %v3491_v10, 2  ;;  %v3538_v0 = vsel %vm245_vm0, %v424_v52, %v426_v11 }
  0xf5   : > { %v2150_v51 = vunpack.i.h.bf16 %v2148_v35  ;;  %v2149_v43 = vunpack.i.l.bf16 %v2148_v35  ;;  %v1209_v18 = vsel %vm1201_vm2, %v2556_v9, %v2155_v48  ;;  %v1208_v34 = vsel %vm1201_vm2, %v2557_v30, %v2154_v1  ;;  %v2559_v35 = vld [vmem:[%s2717_s25 + $0x108] sm:$0xff] }
  0xf6   : > { %2437 = vrot.lane.b32.xlu0 %v3361_v60, %s2645_s3  ;;  %1824 = vmatprep.subr.msk.bf16.mxu0 %vm3119_vm11, %v1822_v53  ;;  %v3452_v47 = vpop.permute.xlu1 %2162 }
  0xf7   : > { %v1438_v22 = vsel %vm1432_vm9, %v1405_v63, %v2150_v51  ;;  %v1437_v29 = vsel %vm1432_vm9, %v1404_v36, %v2149_v43  ;;  %v2165_v44 = vunpack.i.h.bf16 %v3452_v47  ;;  %v2164_v13 = vunpack.i.l.bf16 %v3452_v47 }
  0xf8   : > { %v1825_v61 = vpack.c.bf16 %v1438_v22, %v1437_v29  ;;  %v2158_v8 = vpop.permute.xlu0 %2157  ;;  %2452 = vrot.lane.b32.xlu1 %v2773_v37, %s2646_s4 }
  0xf9   : > { %v2160_v21 = vunpack.i.h.bf16 %v2158_v8  ;;  %v2159_v26 = vunpack.i.l.bf16 %v2158_v8  ;;  %v1241_v32 = vsel %vm1234_vm3, %v1208_v34, %v2164_v13  ;;  %v1242_v59 = vsel %vm1234_vm3, %v1209_v18, %v2165_v44 }
  0xfa   : > { %2447 = vrot.lane.b32.xlu0 %v3456_v41, %s2646_s4  ;;  %1827 = vmatpush3.bf16.xpose.msk.msra.mxu0 %vm3119_vm11, %v1825_v61  ;;  %v2173_v58 = vpop.permute.xlu1 %2172 }
  0xfb   : > { %v2174_v6 = vunpack.i.l.bf16 %v2173_v58 }
  0xfc   : > { %v3478_v46 = vpop.permute.xlu0 %2167  ;;  %2462 = vrot.lane.b32.xlu1 %v3292_v42, %s2640_s26 }
  0xfd   : > { %v2170_v62 = vunpack.i.h.bf16 %v3478_v46  ;;  %v2169_v24 = vunpack.i.l.bf16 %v3478_v46  ;;  %v1274_v22 = vsel %vm1267_vm4, %v1241_v32, %v2174_v6 }
  0xfe   : > { %2457 = vrot.lane.b32.xlu0 %v3476_v14, %s2647_s5  ;;  %v3484_v28 = vpop.permute.xlu1 %2182 }
  0xff   : > { %v2184_v52 = vunpack.i.l.bf16 %v3484_v28 }
 0x100   : > { %v3486_v20 = vpop.permute.xlu0 %2177  ;;  %2472 = vrot.lane.b32.xlu1 %v3282_v25, %s2640_s26  ;;  %v3510_v25 = vld [vmem:[%s2717_s25 + $0xd8] sm:$0xff]  ;;  %s2648_s26 = smov [#allocation2]  }
 0x101   : > { %v2521_v38 = vpack.i.bf16 %v3513_v3, %v3510_v25  ;;  %v2180_v63 = vunpack.i.h.bf16 %v3486_v20  ;;  %v2179_v47 = vunpack.i.l.bf16 %v3486_v20  ;;  %v2185_v20 = vunpack.i.h.bf16 %v3484_v28 }
 0x102   : > { %2467 = vrot.lane.b32.xlu0 %v2791_v50, %s2647_s5  ;;  %v3501_v42 = vpop.permute.xlu1 %2192  ;;  %v1307_v30 = vsel %vm1300_vm5, %v1274_v22, %v2184_v52  ;;  %v2526_v3 = vpack.i.bf16 %v3538_v0, %v3533_v4  ;;  %v3626_v4 = vld [vmem:[%s3894_s1] sm:$0xff] }
 0x103   : > { %v2195_v1 = vunpack.i.h.bf16 %v3501_v42  ;;  %1808 = vmatprep.mubr.msk.f32.mxu0 %vm1465_vm10, %v3626_v4 }
 0x104   : > { %v3505_v49 = vpop.permute.xlu0 %2187  ;;  %2482 = vrot.lane.b32.xlu1 %v3327_v39, %s2641_s27  ;;  %v2145_v39 = vunpack.i.h.bf16 %v3416_v31  ;;  %v2175_v31 = vunpack.i.h.bf16 %v2173_v58 }
 0x105   : > { %v2190_v23 = vunpack.i.h.bf16 %v3505_v49  ;;  %v2189_v17 = vunpack.i.l.bf16 %v3505_v49 }
 0x106   : > { %2477 = vrot.lane.b32.xlu0 %v3315_v27, %s2641_s27  ;;  %v3529_v33 = vpop.permute.xlu1 %2202  ;;  %v431_v27 = vrot.slane %v3497_v54, 2  ;;  %v1225_v53 = vsel %vm1201_vm2, %v2558_v40, %v2145_v39  ;;  %v1275_v29 = vsel %vm1267_vm4, %v1242_v59, %v2175_v31  ;;  %v2194_v39 = vunpack.i.l.bf16 %v3501_v42  ;;  %s2580_s27 = sshll.u32 %s2648_s26, 4  ;;  %s2581_s27 = int_to_ptr.vmem [resolvable:$false] %s2580_s27 }
 0x107   : > { %v1258_v43 = vsel %vm1234_vm3, %v1225_v53, %v2160_v21  ;;  %v2205_v28 = vunpack.i.h.bf16 %v3529_v33  ;;  %v2204_v13 = vunpack.i.l.bf16 %v3529_v33  ;;  %p2583_p0 = scmp.lt.s32.totalorder %s3853_s21, %s2581_s27 }
 0x108   : > { %v2198_v19 = vpop.permute.xlu0 %2197  ;;  %2492 = vrot.lane.b32.xlu1 %v3355_v12, %s2642_s28  ;;  %v1224_v12 = vsel %vm1201_vm2, %v2559_v35, %v2144_v56  ;;  %v1291_v8 = vsel %vm1267_vm4, %v1258_v43, %v2170_v62 }
 0x109   : > { %v1257_v36 = vsel %vm1234_vm3, %v1224_v12, %v2159_v26  ;;  %v2200_v58 = vunpack.i.h.bf16 %v2198_v19  ;;  %v2199_v46 = vunpack.i.l.bf16 %v2198_v19 }
 0x10a   : > { %2487 = vrot.lane.b32.xlu0 %v3361_v60, %s2642_s28  ;;  %v2213_v51 = vpop.permute.xlu1 %2212  ;;  %v1290_v60 = vsel %vm1267_vm4, %v1257_v36, %v2169_v24  ;;  %v1340_v24 = vsel %vm1333_vm6, %v1307_v30, %v2194_v39  ;;  %s2582_s28 = scalar_lea.vmem %s2581_s27, 512 }
 0x10b   : > { %v1323_v48 = vsel %vm1300_vm5, %v1290_v60, %v2179_v47  ;;  %v2215_v19 = vunpack.i.h.bf16 %v2213_v51  ;;  %v2214_v42 = vunpack.i.l.bf16 %v2213_v51  ;;  %p2584_p1 = scmp.lt.s32.totalorder %s2582_s28, %s2576_s13 }
 0x10c   : > { %v2208_v61 = vpop.permute.xlu0 %2207  ;;  %2502 = vrot.lane.b32.xlu1 %v2773_v37, %s2643_s29  ;;  %v1324_v37 = vsel %vm1300_vm5, %v1291_v8, %v2180_v63  ;;  %v1356_v56 = vsel %vm1333_vm6, %v1323_v48, %v2189_v17  ;;  %v430_v63 = vsel %vm326_vm1, %v428_v2, %v429_v57  ;;  %v2561_v48 = vld [vmem:[%s2717_s25 + $0x60] sm:$0xff] }
 0x10d   : > { %v2210_v55 = vunpack.i.h.bf16 %v2208_v61  ;;  %v2209_v11 = vunpack.i.l.bf16 %v2208_v61  ;;  %v1357_v44 = vsel %vm1333_vm6, %v1324_v37, %v2190_v23  ;;  %p2585_p2 = por %p2584_p1, %p2583_p0 }
 0x10e   : > { %2497 = vrot.lane.b32.xlu0 %v3456_v41, %s2643_s29  ;;  %v3571_v49 = vpop.permute.xlu1 %2222  ;;  %v1389_v41 = vsel %vm1366_vm7, %v1356_v56, %v2199_v46  ;;  %v1390_v26 = vsel %vm1366_vm7, %v1357_v44, %v2200_v58  ;;  %v2562_v56 = vld [vmem:[%s2717_s25 + $0x128] sm:$0xff]  ;;  %v2563_v44 = vld [vmem:[%s2717_s25 + $0x120] sm:$0xff] }
 0x10f   : > { %v1422_v9 = vsel %vm1399_vm8, %v1389_v41, %v2209_v11  ;;  %v1423_v18 = vsel %vm1399_vm8, %v1390_v26, %v2210_v55  ;;  %v2225_v23 = vunpack.i.h.bf16 %v3571_v49  ;;  %v2224_v17 = vunpack.i.l.bf16 %v3571_v49  ;;  %v2560_v55 = vld [vmem:[%s2717_s25 + $0x68] sm:$0xff]  ;;  %p2586_p3 = pnand %p2585_p2, %p2579_p13 }
 0x110   : > { %v2218_v21 = vpop.permute.xlu0 %2217  ;;  %2512 = vrot.lane.b32.xlu1 %v2791_v50, %s2644_s30  ;;  %v1308_v50 = vsel %vm1300_vm5, %v1275_v29, %v2185_v20 }
 0x111   : > { %v2220_v31 = vunpack.i.h.bf16 %v2218_v21  ;;  %v2219_v6 = vunpack.i.l.bf16 %v2218_v21  ;;  %v1341_v40 = vsel %vm1333_vm6, %v1308_v50, %v2195_v1  ;;  %v1227_v49 = vsel %vm1201_vm2, %v2562_v56, %v2225_v23 }
 0x112   : > { %2507 = vrot.lane.b32.xlu0 %v3476_v14, %s2644_s30  ;;  %v2233_v33 = vpop.permute.xlu1 %2232  ;;  %v1373_v14 = vsel %vm1366_vm7, %v1340_v24, %v2204_v13  ;;  %v1374_v12 = vsel %vm1366_vm7, %v1341_v40, %v2205_v28  ;;  %v1226_v28 = vsel %vm1201_vm2, %v2563_v44, %v2224_v17 }
 0x113   : > { %v1455_v34 = vsel %vm1432_vm9, %v1422_v9, %v2219_v6  ;;  %v1456_v62 = vsel %vm1432_vm9, %v1423_v18, %v2220_v31  ;;  %v1406_v51 = vsel %vm1399_vm8, %v1373_v14, %v2214_v42  ;;  %v1407_v43 = vsel %vm1399_vm8, %v1374_v12, %v2215_v19 }
 0x114   : > { %v1828_v53 = vpack.c.bf16 %v1456_v62, %v1455_v34  ;;  %v2228_v35 = vpop.permute.xlu0 %2227  ;;  %2522 = vrot.lane.b32.xlu1 %v2521_v38, %s2645_s3  ;;  %v2235_v22 = vunpack.i.h.bf16 %v2233_v33  ;;  %v2234_v29 = vunpack.i.l.bf16 %v2233_v33 }
 0x115   : > { %v2230_v32 = vunpack.i.h.bf16 %v2228_v35  ;;  %v2229_v59 = vunpack.i.l.bf16 %v2228_v35 }
 0x116   : > { %2517 = vrot.lane.b32.xlu0 %v2516_v45, %s2645_s3  ;;  %1830 = vmatprep.subr.msk.bf16.mxu0 %vm3119_vm11, %v1828_v53  ;;  %v2243_v25 = vpop.permute.xlu1 %2242  ;;  %v432_v45 = vsel %vm326_vm1, %v429_v57, %v431_v27  ;;  %v1211_v11 = vsel %vm1201_vm2, %v2560_v55, %v2235_v22  ;;  %v1210_v37 = vsel %vm1201_vm2, %v2561_v48, %v2234_v29 }
 0x117   : > { %v1440_v38 = vsel %vm1432_vm9, %v1407_v43, %v2230_v32  ;;  %v1439_v36 = vsel %vm1432_vm9, %v1406_v51, %v2229_v59  ;;  %v2536_v15 = vpack.i.bf16 %v432_v45, %v430_v63  ;;  %v2245_v61 = vunpack.i.h.bf16 %v2243_v25 }
 0x118   : > { %v1831_v0 = vpack.c.bf16 %v1440_v38, %v1439_v36  ;;  %v2238_v47 = vpop.permute.xlu0 %2237  ;;  %2532 = vrot.lane.b32.xlu1 %v2812_v5, %s2646_s4 }
 0x119   : > { %v2240_v8 = vunpack.i.h.bf16 %v2238_v47  ;;  %v2239_v58 = vunpack.i.l.bf16 %v2238_v47  ;;  %v1244_v21 = vsel %vm1234_vm3, %v1211_v11, %v2245_v61 }
 0x11a   : > { %2527 = vrot.lane.b32.xlu0 %v2526_v3, %s2646_s4  ;;  %1833 = vmatpush3.bf16.xpose.msk.msra.mxu0 %vm3119_vm11, %v1831_v0  ;;  %v2253_v10 = vpop.permute.xlu1 %2252 }
 0x11b   : > { %v2255_v46 = vunpack.i.h.bf16 %v2253_v10  ;;  %v2254_v20 = vunpack.i.l.bf16 %v2253_v10  ;;  %v1260_v26 = vsel %vm1234_vm3, %v1227_v49, %v2240_v8  ;;  %v1259_v31 = vsel %vm1234_vm3, %v1226_v28, %v2239_v58 }
 0x11c   : > { %v2248_v54 = vpop.permute.xlu0 %2247  ;;  %2542 = vrot.lane.b32.xlu1 %v2822_v16, %s2647_s5  ;;  %v2244_v16 = vunpack.i.l.bf16 %v2243_v25 }
 0x11d   : > { %v2250_v1 = vunpack.i.h.bf16 %v2248_v54  ;;  %v2249_v39 = vunpack.i.l.bf16 %v2248_v54  ;;  %v1277_v9 = vsel %vm1267_vm4, %v1244_v21, %v2255_v46 }
 0x11e   : > { %2537 = vrot.lane.b32.xlu0 %v2536_v15, %s2647_s5  ;;  %v3638_v57 = vpop.permute.xlu1 %2262  ;;  %v1243_v13 = vsel %vm1234_vm3, %v1210_v37, %v2244_v16 }
 0x11f   : > { %v1276_v42 = vsel %vm1267_vm4, %v1243_v13, %v2254_v20  ;;  %v1292_v50 = vsel %vm1267_vm4, %v1259_v31, %v2249_v39  ;;  %v1293_v34 = vsel %vm1267_vm4, %v1260_v26, %v2250_v1  ;;  %v2265_v40 = vunpack.i.h.bf16 %v3638_v57 }
 0x120   : > { %v2258_v5 = vpop.permute.xlu0 %2257  ;;  %v2264_v53 = vunpack.i.l.bf16 %v3638_v57 }
 0x121   : > { %v2260_v6 = vunpack.i.h.bf16 %v2258_v5  ;;  %v2259_v19 = vunpack.i.l.bf16 %v2258_v5  ;;  %v1310_v22 = vsel %vm1300_vm5, %v1277_v9, %v2265_v40  ;;  %v2565_v40 = vld [vmem:[%s2717_s25 + $0x78] sm:$0xff] }
 0x122   : > { %v3640_v2 = vpop.permute.xlu1 %2272 }
 0x123   : > { %v1325_v32 = vsel %vm1300_vm5, %v1292_v50, %v2259_v19  ;;  %v1326_v59 = vsel %vm1300_vm5, %v1293_v34, %v2260_v6  ;;  %v2275_v51 = vunpack.i.h.bf16 %v3640_v2  ;;  %v2274_v43 = vunpack.i.l.bf16 %v3640_v2 }
 0x124   : > { %v2268_v27 = vpop.permute.xlu0 %2267 }
 0x125   : > { %v2270_v18 = vunpack.i.h.bf16 %v2268_v27  ;;  %v2269_v33 = vunpack.i.l.bf16 %v2268_v27  ;;  %v1309_v27 = vsel %vm1300_vm5, %v1276_v42, %v2264_v53  ;;  %v1343_v61 = vsel %vm1333_vm6, %v1310_v22, %v2275_v51 }
 0x126   : > { %v3644_v60 = vpop.permute.xlu1 %2282  ;;  %v1342_v17 = vsel %vm1333_vm6, %v1309_v27, %v2274_v43 }
 0x127   : > { %v1358_v25 = vsel %vm1333_vm6, %v1325_v32, %v2269_v33  ;;  %v1359_v3 = vsel %vm1333_vm6, %v1326_v59, %v2270_v18  ;;  %v2285_v38 = vunpack.i.h.bf16 %v3644_v60  ;;  %v2284_v36 = vunpack.i.l.bf16 %v3644_v60  ;;  %v2566_v32 = vld [vmem:[%s2717_s25 + $0x140] sm:$0xff]  ;;  %v2567_v59 = vld [vmem:[%s2717_s25 + $0x138] sm:$0xff] }
 0x128   : > { %v2278_v52 = vpop.permute.xlu0 %2277 }
 0x129   : > { %v2280_v62 = vunpack.i.h.bf16 %v2278_v52  ;;  %v2279_v24 = vunpack.i.l.bf16 %v2278_v52  ;;  %v1375_v8 = vsel %vm1366_vm7, %v1342_v17, %v2284_v36  ;;  %v1376_v58 = vsel %vm1366_vm7, %v1343_v61, %v2285_v38 }
 0x12a   : > { %v2293_v41 = vpop.permute.xlu1 %2292 }
 0x12b   : > { %v1391_v45 = vsel %vm1366_vm7, %v1358_v25, %v2279_v24  ;;  %v1392_v0 = vsel %vm1366_vm7, %v1359_v3, %v2280_v62  ;;  %v2295_v15 = vunpack.i.h.bf16 %v2293_v41  ;;  %v2294_v54 = vunpack.i.l.bf16 %v2293_v41  ;;  %v2564_v62 = vld [vmem:[%s2717_s25 + $0x80] sm:$0xff] }
 0x12c   : > { %v2288_v30 = vpop.permute.xlu0 %2287 }
 0x12d   : > { %v2290_v35 = vunpack.i.h.bf16 %v2288_v30  ;;  %v2289_v14 = vunpack.i.l.bf16 %v2288_v30  ;;  %v1408_v52 = vsel %vm1399_vm8, %v1375_v8, %v2294_v54  ;;  %v1409_v55 = vsel %vm1399_vm8, %v1376_v58, %v2295_v15 }
 0x12e   : > { %v3664_v12 = vpop.permute.xlu1 %2302 }
 0x12f   : > { %v1424_v57 = vsel %vm1399_vm8, %v1391_v45, %v2289_v14  ;;  %v1425_v5 = vsel %vm1399_vm8, %v1392_v0, %v2290_v35  ;;  %v2305_v31 = vunpack.i.h.bf16 %v3664_v12  ;;  %v2304_v6 = vunpack.i.l.bf16 %v3664_v12 }
 0x130   : > { %v2298_v63 = vpop.permute.xlu0 %2297 }
 0x131   : > { %v2300_v47 = vunpack.i.h.bf16 %v2298_v63  ;;  %v2299_v10 = vunpack.i.l.bf16 %v2298_v63  ;;  %v1229_v12 = vsel %vm1201_vm2, %v2566_v32, %v2305_v31  ;;  %v1228_v51 = vsel %vm1201_vm2, %v2567_v59, %v2304_v6 }
 0x132   : > { %v2313_v2 = vpop.permute.xlu1 %2312 }
 0x133   : > { %v1457_v29 = vsel %vm1432_vm9, %v1424_v57, %v2299_v10  ;;  %v1458_v23 = vsel %vm1432_vm9, %v1425_v5, %v2300_v47  ;;  %v2315_v41 = vunpack.i.h.bf16 %v2313_v2  ;;  %v2314_v26 = vunpack.i.l.bf16 %v2313_v2 }
 0x134   : > { %v1834_v16 = vpack.c.bf16 %v1458_v23, %v1457_v29  ;;  %v2308_v60 = vpop.permute.xlu0 %2307 }
 0x135   : > { %v2310_v46 = vunpack.i.h.bf16 %v2308_v60  ;;  %v2309_v20 = vunpack.i.l.bf16 %v2308_v60  ;;  %v1213_v24 = vsel %vm1201_vm2, %v2564_v62, %v2315_v41  ;;  %v1212_v53 = vsel %vm1201_vm2, %v2565_v40, %v2314_v26 }
 0x136   : > { %1836 = vmatprep.subr.msk.bf16.mxu0 %vm3119_vm11, %v1834_v16  ;;  %v2323_v11 = vpop.permute.xlu1 %2322 }
 0x137   : > { %v1442_v48 = vsel %vm1432_vm9, %v1409_v55, %v2310_v46  ;;  %v1441_v37 = vsel %vm1432_vm9, %v1408_v52, %v2309_v20  ;;  %v2325_v19 = vunpack.i.h.bf16 %v2323_v11  ;;  %v2324_v42 = vunpack.i.l.bf16 %v2323_v11 }
 0x138   : > { %v1837_v1 = vpack.c.bf16 %v1442_v48, %v1441_v37  ;;  %v2318_v39 = vpop.permute.xlu0 %2317 }
 0x139   : > { %v2320_v18 = vunpack.i.h.bf16 %v2318_v39  ;;  %v2319_v33 = vunpack.i.l.bf16 %v2318_v39  ;;  %v1245_v43 = vsel %vm1234_vm3, %v1212_v53, %v2324_v42  ;;  %v1246_v25 = vsel %vm1234_vm3, %v1213_v24, %v2325_v19 }
 0x13a   : > { %1839 = vmatpush3.bf16.xpose.msk.msra.mxu0 %vm3119_vm11, %v1837_v1  ;;  %v2333_v56 = vpop.permute.xlu1 %2332 }
 0x13b   : > { %v2335_v30 = vunpack.i.h.bf16 %v2333_v56  ;;  %v2334_v50 = vunpack.i.l.bf16 %v2333_v56  ;;  %v1262_v38 = vsel %vm1234_vm3, %v1229_v12, %v2320_v18  ;;  %v1261_v36 = vsel %vm1234_vm3, %v1228_v51, %v2319_v33 }
 0x13c   : > { %v2328_v49 = vpop.permute.xlu0 %2327 }
 0x13d   : > { %v2330_v35 = vunpack.i.h.bf16 %v2328_v49  ;;  %v2329_v14 = vunpack.i.l.bf16 %v2328_v49  ;;  %v1278_v0 = vsel %vm1267_vm4, %v1245_v43, %v2334_v50  ;;  %v1279_v47 = vsel %vm1267_vm4, %v1246_v25, %v2335_v30 }
 0x13e   : > { %v3694_v44 = vpop.permute.xlu1 %2342 }
 0x13f   : > { %v1294_v57 = vsel %vm1267_vm4, %v1261_v36, %v2329_v14  ;;  %v1295_v5 = vsel %vm1267_vm4, %v1262_v38, %v2330_v35  ;;  %v2345_v22 = vunpack.i.h.bf16 %v3694_v44  ;;  %v2344_v29 = vunpack.i.l.bf16 %v3694_v44 }
 0x140   : > { %v2338_v28 = vpop.permute.xlu0 %2337 }
 0x141   : > { %v2340_v63 = vunpack.i.h.bf16 %v2338_v28  ;;  %v2339_v45 = vunpack.i.l.bf16 %v2338_v28  ;;  %v1312_v41 = vsel %vm1300_vm5, %v1279_v47, %v2345_v22  ;;  %v2569_v22 = vld [vmem:[%s2717_s25 + $0x90] sm:$0xff] }
 0x142   : > { %v3696_v13 = vpop.permute.xlu1 %2352 }
 0x143   : > { %v1327_v16 = vsel %vm1300_vm5, %v1294_v57, %v2339_v45  ;;  %v1328_v60 = vsel %vm1300_vm5, %v1295_v5, %v2340_v63  ;;  %v2355_v8 = vunpack.i.h.bf16 %v3696_v13  ;;  %v2354_v58 = vunpack.i.l.bf16 %v3696_v13 }
 0x144   : > { %v2348_v21 = vpop.permute.xlu0 %2347 }
 0x145   : > { %v2350_v10 = vunpack.i.h.bf16 %v2348_v21  ;;  %v2349_v15 = vunpack.i.l.bf16 %v2348_v21  ;;  %v1311_v21 = vsel %vm1300_vm5, %v1278_v0, %v2344_v29  ;;  %v1345_v19 = vsel %vm1333_vm6, %v1312_v41, %v2355_v8 }
 0x146   : > { %v3700_v9 = vpop.permute.xlu1 %2362  ;;  %v1344_v6 = vsel %vm1333_vm6, %v1311_v21, %v2354_v58 }
 0x147   : > { %v1360_v46 = vsel %vm1333_vm6, %v1327_v16, %v2349_v15  ;;  %v1361_v20 = vsel %vm1333_vm6, %v1328_v60, %v2350_v10  ;;  %v2365_v52 = vunpack.i.h.bf16 %v3700_v9  ;;  %v2364_v55 = vunpack.i.l.bf16 %v3700_v9  ;;  %v2570_v16 = vld [vmem:[%s2717_s25 + $0x158] sm:$0xff]  ;;  %v2571_v60 = vld [vmem:[%s2717_s25 + $0x150] sm:$0xff] }
 0x148   : > { %v2358_v34 = vpop.permute.xlu0 %2357 }
 0x149   : > { %v2360_v2 = vunpack.i.h.bf16 %v2358_v34  ;;  %v2359_v27 = vunpack.i.l.bf16 %v2358_v34  ;;  %v1377_v18 = vsel %vm1366_vm7, %v1344_v6, %v2364_v55  ;;  %v1378_v33 = vsel %vm1366_vm7, %v1345_v19, %v2365_v52 }
 0x14a   : > { %v2373_v3 = vpop.permute.xlu1 %2372 }
 0x14b   : > { %v1393_v48 = vsel %vm1366_vm7, %v1360_v46, %v2359_v27  ;;  %v1394_v37 = vsel %vm1366_vm7, %v1361_v20, %v2360_v2  ;;  %v2375_v56 = vunpack.i.h.bf16 %v2373_v3  ;;  %v2374_v49 = vunpack.i.l.bf16 %v2373_v3  ;;  %v2568_v2 = vld [vmem:[%s2717_s25 + $0x98] sm:$0xff] }
 0x14c   : > { %v2368_v54 = vpop.permute.xlu0 %2367 }
 0x14d   : > { %v2370_v23 = vunpack.i.h.bf16 %v2368_v54  ;;  %v2369_v17 = vunpack.i.l.bf16 %v2368_v54  ;;  %v1410_v34 = vsel %vm1399_vm8, %v1377_v18, %v2374_v49  ;;  %v1411_v62 = vsel %vm1399_vm8, %v1378_v33, %v2375_v56 }
 0x14e   : > { %v3720_v61 = vpop.permute.xlu1 %2382 }
 0x14f   : > { %v1426_v44 = vsel %vm1399_vm8, %v1393_v48, %v2369_v17  ;;  %v1427_v28 = vsel %vm1399_vm8, %v1394_v37, %v2370_v23  ;;  %v2385_v36 = vunpack.i.h.bf16 %v3720_v61  ;;  %v2384_v63 = vunpack.i.l.bf16 %v3720_v61 }
 0x150   : > { %v2378_v11 = vpop.permute.xlu0 %2377 }
 0x151   : > { %v2380_v1 = vunpack.i.h.bf16 %v2378_v11  ;;  %v2379_v39 = vunpack.i.l.bf16 %v2378_v11  ;;  %v1231_v61 = vsel %vm1201_vm2, %v2570_v16, %v2385_v36  ;;  %v1230_v8 = vsel %vm1201_vm2, %v2571_v60, %v2384_v63 }
 0x152   : > { %v2393_v13 = vpop.permute.xlu1 %2392 }
 0x153   : > { %v1459_v26 = vsel %vm1432_vm9, %v1426_v44, %v2379_v39  ;;  %v1460_v31 = vsel %vm1432_vm9, %v1427_v28, %v2380_v1  ;;  %v2395_v3 = vunpack.i.h.bf16 %v2393_v13  ;;  %v2394_v38 = vunpack.i.l.bf16 %v2393_v13 }
 0x154   : > { %v1840_v42 = vpack.c.bf16 %v1460_v31, %v1459_v26  ;;  %v2388_v9 = vpop.permute.xlu0 %2387 }
 0x155   : > { %v2390_v30 = vunpack.i.h.bf16 %v2388_v9  ;;  %v2389_v50 = vunpack.i.l.bf16 %v2388_v9  ;;  %v1215_v27 = vsel %vm1201_vm2, %v2568_v2, %v2395_v3  ;;  %v1214_v29 = vsel %vm1201_vm2, %v2569_v22, %v2394_v38 }
 0x156   : > { %1842 = vmatprep.subr.msk.bf16.mxu0 %vm3119_vm11, %v1840_v42  ;;  %v2403_v24 = vpop.permute.xlu1 %2402 }
 0x157   : > { %v1444_v40 = vsel %vm1432_vm9, %v1411_v62, %v2390_v30  ;;  %v1443_v53 = vsel %vm1432_vm9, %v1410_v34, %v2389_v50  ;;  %v2405_v45 = vunpack.i.h.bf16 %v2403_v24  ;;  %v2404_v0 = vunpack.i.l.bf16 %v2403_v24 }
 0x158   : > { %v1843_v35 = vpack.c.bf16 %v1444_v40, %v1443_v53  ;;  %v2398_v14 = vpop.permute.xlu0 %2397 }
 0x159   : > { %v2400_v10 = vunpack.i.h.bf16 %v2398_v14  ;;  %v2399_v15 = vunpack.i.l.bf16 %v2398_v14  ;;  %v1247_v58 = vsel %vm1234_vm3, %v1214_v29, %v2404_v0  ;;  %v1248_v46 = vsel %vm1234_vm3, %v1215_v27, %v2405_v45 }
 0x15a   : > { %1845 = vmatpush3.bf16.xpose.msk.msra.mxu0 %vm3119_vm11, %v1843_v35  ;;  %v2413_v32 = vpop.permute.xlu1 %2412 }
 0x15b   : > { %v2415_v54 = vunpack.i.h.bf16 %v2413_v32  ;;  %v2414_v57 = vunpack.i.l.bf16 %v2413_v32  ;;  %v1264_v52 = vsel %vm1234_vm3, %v1231_v61, %v2400_v10  ;;  %v1263_v55 = vsel %vm1234_vm3, %v1230_v8, %v2399_v15 }
 0x15c   : > { %v2408_v12 = vpop.permute.xlu0 %2407 }
 0x15d   : > { %v2410_v23 = vunpack.i.h.bf16 %v2408_v12  ;;  %v2409_v17 = vunpack.i.l.bf16 %v2408_v12  ;;  %v1280_v37 = vsel %vm1267_vm4, %v1247_v58, %v2414_v57  ;;  %v1281_v1 = vsel %vm1267_vm4, %v1248_v46, %v2415_v54 }
 0x15e   : > { %v3750_v59 = vpop.permute.xlu1 %2422 }
 0x15f   : > { %v1296_v44 = vsel %vm1267_vm4, %v1263_v55, %v2409_v17  ;;  %v1297_v28 = vsel %vm1267_vm4, %v1264_v52, %v2410_v23  ;;  %v2425_v41 = vunpack.i.h.bf16 %v3750_v59  ;;  %v2424_v26 = vunpack.i.l.bf16 %v3750_v59 }
 0x160   : > { %v2418_v51 = vpop.permute.xlu0 %2417 }
 0x161   : > { %v2420_v11 = vunpack.i.h.bf16 %v2418_v51  ;;  %v2419_v48 = vunpack.i.l.bf16 %v2418_v51  ;;  %v1314_v3 = vsel %vm1300_vm5, %v1281_v1, %v2425_v41  ;;  %v2574_v41 = vld [vmem:[%s2717_s25 + $0xb0] sm:$0xff] }
 0x162   : > { %v3752_v43 = vpop.permute.xlu1 %2432 }
 0x163   : > { %v1329_v42 = vsel %vm1300_vm5, %v1296_v44, %v2419_v48  ;;  %v1330_v9 = vsel %vm1300_vm5, %v1297_v28, %v2420_v11  ;;  %v2435_v18 = vunpack.i.h.bf16 %v3752_v43  ;;  %v2434_v33 = vunpack.i.l.bf16 %v3752_v43  ;;  %v2572_v44 = vld [vmem:[%s2717_s25 + $0x170] sm:$0xff] }
 0x164   : > { %v2428_v25 = vpop.permute.xlu0 %2427 }
 0x165   : > { %v2430_v39 = vunpack.i.h.bf16 %v2428_v25  ;;  %v2429_v56 = vunpack.i.l.bf16 %v2428_v25  ;;  %v1313_v25 = vsel %vm1300_vm5, %v1280_v37, %v2424_v26  ;;  %v1347_v45 = vsel %vm1333_vm6, %v1314_v3, %v2435_v18 }
 0x166   : > { %v3756_v47 = vpop.permute.xlu1 %2442  ;;  %v1346_v63 = vsel %vm1333_vm6, %v1313_v25, %v2434_v33 }
 0x167   : > { %v1362_v30 = vsel %vm1333_vm6, %v1329_v42, %v2429_v56  ;;  %v1363_v50 = vsel %vm1333_vm6, %v1330_v9, %v2430_v39  ;;  %v2445_v34 = vunpack.i.h.bf16 %v3756_v47  ;;  %v2444_v62 = vunpack.i.l.bf16 %v3756_v47 }
 0x168   : > { %v2438_v5 = vpop.permute.xlu0 %2437 }
 0x169   : > { %v2440_v13 = vunpack.i.h.bf16 %v2438_v5  ;;  %v2439_v21 = vunpack.i.l.bf16 %v2438_v5  ;;  %v1379_v10 = vsel %vm1366_vm7, %v1346_v63, %v2444_v62  ;;  %v1380_v15 = vsel %vm1366_vm7, %v1347_v45, %v2445_v34 }
 0x16a   : > { %v2453_v20 = vpop.permute.xlu1 %2452 }
 0x16b   : > { %v1395_v40 = vsel %vm1366_vm7, %v1362_v30, %v2439_v21  ;;  %v1396_v53 = vsel %vm1366_vm7, %v1363_v50, %v2440_v13  ;;  %v2455_v32 = vunpack.i.h.bf16 %v2453_v20  ;;  %v2454_v12 = vunpack.i.l.bf16 %v2453_v20  ;;  %v2573_v13 = vld [vmem:[%s2717_s25 + $0x168] sm:$0xff] }
 0x16c   : > { %v2448_v49 = vpop.permute.xlu0 %2447 }
 0x16d   : > { %v2450_v31 = vunpack.i.h.bf16 %v2448_v49  ;;  %v2449_v6 = vunpack.i.l.bf16 %v2448_v49  ;;  %v1412_v5 = vsel %vm1399_vm8, %v1379_v10, %v2454_v12  ;;  %v1413_v2 = vsel %vm1399_vm8, %v1380_v15, %v2455_v32 }
 0x16e   : > { %v2463_v19 = vpop.permute.xlu1 %2462 }
 0x16f   : > { %v1428_v59 = vsel %vm1399_vm8, %v1395_v40, %v2449_v6  ;;  %v1429_v51 = vsel %vm1399_vm8, %v1396_v53, %v2450_v31  ;;  %v2465_v58 = vunpack.i.h.bf16 %v2463_v19  ;;  %v2464_v46 = vunpack.i.l.bf16 %v2463_v19  ;;  %v2575_v31 = vld [vmem:[%s2717_s25 + $0xa8] sm:$0xff]  ;;  %s1658_s25 = scalar_lea.sflag [#allocation3], %s134_s8 }
 0x170   : > { %v2458_v24 = vpop.permute.xlu0 %2457 }
 0x171   : > { %v2460_v35 = vunpack.i.h.bf16 %v2458_v24  ;;  %v2459_v14 = vunpack.i.l.bf16 %v2458_v24  ;;  %v1233_v28 = vsel %vm1201_vm2, %v2572_v44, %v2465_v58  ;;  %v1232_v21 = vsel %vm1201_vm2, %v2573_v13, %v2464_v46 }
 0x172   : > { %v2473_v43 = vpop.permute.xlu1 %2472 }
 0x173   : > { %v1461_v38 = vsel %vm1432_vm9, %v1428_v59, %v2459_v14  ;;  %v1462_v36 = vsel %vm1432_vm9, %v1429_v51, %v2460_v35  ;;  %v2475_v20 = vunpack.i.h.bf16 %v2473_v43  ;;  %v2474_v52 = vunpack.i.l.bf16 %v2473_v43 }
 0x174   : > { %v1846_v0 = vpack.c.bf16 %v1462_v36, %v1461_v38  ;;  %v2468_v47 = vpop.permute.xlu0 %2467 }
 0x175   : > { %v2470_v54 = vunpack.i.h.bf16 %v2468_v47  ;;  %v2469_v57 = vunpack.i.l.bf16 %v2468_v47  ;;  %v1217_v26 = vsel %vm1201_vm2, %v2574_v41, %v2475_v20  ;;  %v1216_v6 = vsel %vm1201_vm2, %v2575_v31, %v2474_v52 }
 0x176   : > { %1848 = vmatprep.subr.msk.bf16.mxu0 %vm3119_vm11, %v1846_v0  ;;  %v2483_v27 = vpop.permute.xlu1 %2482 }
 0x177   : > { %v1446_v22 = vsel %vm1432_vm9, %v1413_v2, %v2470_v54  ;;  %v1445_v29 = vsel %vm1432_vm9, %v1412_v5, %v2469_v57  ;;  %v2485_v11 = vunpack.i.h.bf16 %v2483_v27  ;;  %v2484_v48 = vunpack.i.l.bf16 %v2483_v27 }
 0x178   : > { %v1849_v23 = vpack.c.bf16 %v1446_v22, %v1445_v29  ;;  %v2478_v17 = vpop.permute.xlu0 %2477 }
 0x179   : > { %v2480_v37 = vunpack.i.h.bf16 %v2478_v17  ;;  %v2479_v1 = vunpack.i.l.bf16 %v2478_v17  ;;  %v1249_v18 = vsel %vm1234_vm3, %v1216_v6, %v2484_v48  ;;  %v1250_v33 = vsel %vm1234_vm3, %v1217_v26, %v2485_v11 }
 0x17a   : > { %1851 = vmatpush3.bf16.xpose.msk.msra.mxu0 %vm3119_vm11, %v1849_v23  ;;  %v2493_v16 = vpop.permute.xlu1 %2492 }
 0x17b   : > { %v2495_v39 = vunpack.i.h.bf16 %v2493_v16  ;;  %v2494_v56 = vunpack.i.l.bf16 %v2493_v16  ;;  %v1266_v34 = vsel %vm1234_vm3, %v1233_v28, %v2480_v37  ;;  %v1265_v62 = vsel %vm1234_vm3, %v1232_v21, %v2479_v1 }
 0x17c   : > { %v2488_v61 = vpop.permute.xlu0 %2487 }
 0x17d   : > { %v2490_v19 = vunpack.i.h.bf16 %v2488_v61  ;;  %v2489_v42 = vunpack.i.l.bf16 %v2488_v61  ;;  %v1282_v24 = vsel %vm1267_vm4, %v1249_v18, %v2494_v56  ;;  %v1283_v40 = vsel %vm1267_vm4, %v1250_v33, %v2495_v39 }
 0x17e   : > { %v2503_v60 = vpop.permute.xlu1 %2502 }
 0x17f   : > { %v2505_v30 = vunpack.i.h.bf16 %v2503_v60  ;;  %v2504_v50 = vunpack.i.l.bf16 %v2503_v60  ;;  %v1298_v59 = vsel %vm1267_vm4, %v1265_v62, %v2489_v42  ;;  %v1299_v51 = vsel %vm1267_vm4, %v1266_v34, %v2490_v19 }
 0x180   : > { %v2498_v8 = vpop.permute.xlu0 %2497 }
 0x181   : > { %v2500_v35 = vunpack.i.h.bf16 %v2498_v8  ;;  %v2499_v14 = vunpack.i.l.bf16 %v2498_v8  ;;  %v1315_v38 = vsel %vm1300_vm5, %v1282_v24, %v2504_v50  ;;  %v1316_v36 = vsel %vm1300_vm5, %v1283_v40, %v2505_v30 }
 0x182   : > { %v2513_v55 = vpop.permute.xlu1 %2512 }
 0x183   : > { %v2515_v32 = vunpack.i.h.bf16 %v2513_v55  ;;  %v2514_v12 = vunpack.i.l.bf16 %v2513_v55  ;;  %v1331_v57 = vsel %vm1300_vm5, %v1298_v59, %v2499_v14  ;;  %v1332_v5 = vsel %vm1300_vm5, %v1299_v51, %v2500_v35 }
 0x184   : > { %v2508_v49 = vpop.permute.xlu0 %2507 }
 0x185   : > { %v2510_v43 = vunpack.i.h.bf16 %v2508_v49  ;;  %v2509_v25 = vunpack.i.l.bf16 %v2508_v49  ;;  %v1348_v2 = vsel %vm1333_vm6, %v1315_v38, %v2514_v12  ;;  %v1349_v27 = vsel %vm1333_vm6, %v1316_v36, %v2515_v32 }
 0x186   : > { %v2523_v9 = vpop.permute.xlu1 %2522 }
 0x187   : > { %v2525_v63 = vunpack.i.h.bf16 %v2523_v9  ;;  %v2524_v45 = vunpack.i.l.bf16 %v2523_v9  ;;  %v1364_v22 = vsel %vm1333_vm6, %v1331_v57, %v2509_v25  ;;  %v1365_v29 = vsel %vm1333_vm6, %v1332_v5, %v2510_v43 }
 0x188   : > { %v2518_v53 = vpop.permute.xlu0 %2517 }
 0x189   : > { %v2520_v0 = vunpack.i.h.bf16 %v2518_v53  ;;  %v2519_v47 = vunpack.i.l.bf16 %v2518_v53  ;;  %v1381_v61 = vsel %vm1366_vm7, %v1348_v2, %v2524_v45  ;;  %v1382_v60 = vsel %vm1366_vm7, %v1349_v27, %v2525_v63 }
 0x18a   : > { %v2533_v3 = vpop.permute.xlu1 %2532 }
 0x18b   : > { %v2535_v10 = vunpack.i.h.bf16 %v2533_v3  ;;  %v2534_v15 = vunpack.i.l.bf16 %v2533_v3  ;;  %v1397_v46 = vsel %vm1366_vm7, %v1364_v22, %v2519_v47  ;;  %v1398_v20 = vsel %vm1366_vm7, %v1365_v29, %v2520_v0 }
 0x18c   : > { %v2528_v54 = vpop.permute.xlu0 %2527 }
 0x18d   : > { %v2530_v23 = vunpack.i.h.bf16 %v2528_v54  ;;  %v2529_v17 = vunpack.i.l.bf16 %v2528_v54  ;;  %v1414_v52 = vsel %vm1399_vm8, %v1381_v61, %v2534_v15  ;;  %v1415_v55 = vsel %vm1399_vm8, %v1382_v60, %v2535_v10 }
 0x18e   : > { %v2543_v16 = vpop.permute.xlu1 %2542 }
 0x18f   : > { %v2545_v8 = vunpack.i.h.bf16 %v2543_v16  ;;  %v2544_v58 = vunpack.i.l.bf16 %v2543_v16  ;;  %v1430_v56 = vsel %vm1399_vm8, %v1397_v46, %v2529_v17  ;;  %v1431_v49 = vsel %vm1399_vm8, %v1398_v20, %v2530_v23 }
 0x190   : > { %v2538_v11 = vpop.permute.xlu0 %2537 }
 0x191   : > { %v1447_v48 = vsel %vm1432_vm9, %v1414_v52, %v2544_v58  ;;  %v1448_v37 = vsel %vm1432_vm9, %v1415_v55, %v2545_v8  ;;  %v2540_v1 = vunpack.i.h.bf16 %v2538_v11  ;;  %v2539_v39 = vunpack.i.l.bf16 %v2538_v11 }
 0x192   : > { %v1855_v44 = vpack.c.bf16 %v1448_v37, %v1447_v48 }
 0x193   : > { %v1463_v28 = vsel %vm1432_vm9, %v1430_v56, %v2539_v39  ;;  %v1464_v13 = vsel %vm1432_vm9, %v1431_v49, %v2540_v1 }
 0x194   : > { %v1852_v21 = vpack.c.bf16 %v1464_v13, %v1463_v28 }
 0x196   : > { %1854 = vmatprep.subr.msk.bf16.mxu0 %vm3119_vm11, %v1852_v21 }
 0x197   : > { %1857 = vmatpush3.bf16.xpose.msk.msra.mxu0 %vm3119_vm11, %v1855_v44 }
 0x19e   : > { %1809 = vmatmul.mubr.msk.f32.vlgmr.msra.gmra.mrb[0].mxu0 %vm1465_vm10, %v3626_v4 }
 0x271   : > { %v1631_v41 = vpop.f32.mrb[0].mxu0 }
 0x272   : > { %v1633_v26 = vpop.f32.mrb[1].mxu0 }
 0x273   : > { %v1636_v31 = vadd.f32 %v1633_v26, %v1631_v41 }
 0x275   : > { %1637 = vadd.xlane.f32.xlu0 %v1636_v31 }
 0x302   : > { %v1638_v6 = vpop.xlane.xlu0 %1637 }
 0x303   : > { %v1640_v19 = vmul.f32 0.00390625, %v1638_v6 }
 0x305   : > { %v1641_v42 = vsub.f32 %v1631_v41, %v1640_v19  ;;  %v1642_v9 = vsub.f32 %v1633_v26, %v1640_v19 }
 0x307   : > { %v1643_v18 = vmul.f32 %v1641_v42, %v1641_v42  ;;  %v1644_v33 = vmul.f32 %v1642_v9, %v1642_v9 }
 0x309   : > { %v1645_v30 = vadd.f32 %v1644_v33, %v1643_v18 }
 0x30b   : > { %1646 = vadd.xlane.f32.xlu1 %v1645_v30 }
 0x398   : > { %v1647_v50 = vpop.xlane.xlu1 %1646 }
 0x399   : > { %v1648_v7 = vmul.f32 0.00390625, %v1647_v50 }
 0x39b   : > { %v1649_v34 = vadd.f32 1e-05, %v1648_v7 }
 0x39d   : > { %2546 = vrsqrt.f32 %v1649_v34 }
 0x3a7   : > { %v2547_v4 = vpop.eup %2546 }
 0x3a8   : > { %v1651_v62 = vmul.f32 %v2547_v4, %v1641_v42  ;;  %v1652_v24 = vmul.f32 %v2547_v4, %v1642_v9 }
 0x3aa   : > { %v1653_v40 = vmax.f32 %v1651_v62, 0.0  ;;  %v1654_v53 = vmax.f32 %v1652_v24, 0.0 }
 0x3ac   : > { %1655 = vst [vmem:[%s136_s17] sm:$0xff] %v1653_v40  ;;  %1656 = vst [vmem:[%s136_s17 + $0x8] sm:$0xff] %v1654_v53 }
 0x3ad   : > { %2589 = shalt.err (!%p2586_p3)
}
 0x3ae   : > { %s2590_s29 = scalar_lea.hbm %s3851_s24, 256  ;;  %s2594_s4 = scalar_lea.hbm %s3895_s2, 512 }
 0x3af   : > { %p2591_p4 = scmp.ne.s32.totalorder %s3851_s24, %s2590_s29  ;;  %p2595_p9 = scmp.lt.u32.totalorder %s3851_s24, %s3895_s2 }
 0x3b0   : > { %p2596_p10 = scmp.lt.u32.totalorder %s2594_s4, %s2590_s29  ;;  %p2598_p12 = scmp.lt.u32.totalorder %s2590_s29, %s3851_s24 }
 0x3b1   : > { %p2592_p7 = pnand %p2591_p4, %p2702_p5 }
 0x3b2   : > { %p2597_p11 = por %p2596_p10, %p2595_p9 }
 0x3b3   : > { %p2593_p8 = pneg %p2592_p7 }
 0x3b4   : > { %p2599_p13 = por %p2598_p12, %p2597_p11 }
 0x3b6   : > { %p2600_p0 = pnand %p2599_p13, %p2593_p8 }
 0x3b8   : > { %2603 = shalt.err (!%p2600_p0)
}
 0x3b9   : > { %1859 = dma.vmem_to_hbm [thread:$0]  (%p2702_p5), %s3853_s21, 256, %s3851_s24, %s1658_s25  }
 0x3ba PF: > { %p1865_p1 = scmp.ge.s32.totalorder %s2638_s12, 2  ;;  %s1684_s7 = sand.u32 1, %s2626_s9  }
 0x3bb   : > { %s1685_s8 = scalar_lea.sflag [#allocation3], %s1684_s7 }
 0x3bc   : > { %p1862_p2 = pnand %p1865_p1, %p2706_p6 }
 0x3be   : > { %2621 = dma.done.wait (!%p1862_p2), %s1685_s8, 256  }
 0x3bf   : > { %2623 = vsyncadd (!%p1862_p2), %s1685_s8, 4294967040  ;;  %p12_p3 = scmp.ge.s32.totalorder %s2689_s15, 4   ;;  %s3900_s9 = smov %s2630_s10 }
 0x3c0   : > { %s3901_s10 = smov %s2634_s11  ;;  %s3902_s11 = smov %s2700_s18 }
 0x3c1   : > { %s3903_s12 = smov %s2689_s15  ;;  %14 = sbr.rel (!%p12_p3) target bundleno = 3 (0x3), region = 63 }
 0x3c8   :  { %1690 = vsyncpa [#allocation3], 1 }
 0x3c9   :  { %1692 = vsyncpa [#allocation3 + $0x1], 1 }

</bundles_post_ra>
